<compile_context>
chip_gen: v6e
topology: v6e:2x2x1
jax: 0.10.0
libtpu: 0.0.40
codegen_flags: <defaults>
</compile_context>

<pallas_src>
import functools

import jax
import jax.numpy as jnp
from jax.experimental import pallas as pl
from jax.experimental.pallas import tpu as pltpu


def convkb_kernel(w_ref, cb_ref, h_ref, r_ref, t_ref, fcw_ref, o_ref):
    # w_ref   : SMEM (3, C) f32   conv weights, k-major
    # cb_ref  : SMEM (1, C) f32   conv bias
    # h_ref   : VMEM (D, TB)      head embeddings, batch on lanes
    # r_ref   : VMEM (D, TB)      relation embeddings
    # t_ref   : VMEM (D, TB)      tail embeddings
    # fcw_ref : VMEM (D, C) f32   fc weight, column c = weights of channel c over d
    # o_ref   : VMEM (1, TB) f32  scores (fc bias added outside the kernel)
    h = h_ref[...].astype(jnp.float32)            # (D, TB)
    r = r_ref[...].astype(jnp.float32)
    t = t_ref[...].astype(jnp.float32)
    fcw = fcw_ref[...].astype(jnp.float32)        # (D, C)
    C = fcw.shape[1]

    acc = jnp.zeros_like(h)                       # (D, TB) fused accumulator
    # Fused conv(1x3) + ReLU + fc, unrolled over the (small) channel count.
    # TODO(synk): training-mode dropout (drop_conv) not implemented (inference only).
    for c in range(C):
        conv_c = (w_ref[0, c] * h + w_ref[1, c] * r + w_ref[2, c] * t
                  + cb_ref[0, c])                 # (D, TB)
        act_c = jnp.maximum(conv_c, 0.0)          # ReLU
        acc = acc + fcw[:, c:c + 1] * act_c       # (D,1) broadcast over lanes

    # Single cross-sublane reduction over D -> lane-dense (1, TB) scores.
    o_ref[...] = jnp.sum(acc, axis=0, keepdims=True).astype(o_ref.dtype)


def convkb_pallas(conv_w_k, conv_b, h_t, r_t, t_t, fcw_t, *, tb=256):
    D, Bp = h_t.shape
    C = conv_w_k.shape[1]
    assert Bp % tb == 0 and tb % 128 == 0
    grid = (Bp // tb,)
    return pl.pallas_call(
        convkb_kernel,
        out_shape=jax.ShapeDtypeStruct((1, Bp), jnp.float32),
        grid_spec=pltpu.PrefetchScalarGridSpec(
            num_scalar_prefetch=0,
            grid=grid,
            in_specs=[
                pl.BlockSpec(memory_space=pltpu.MemorySpace.SMEM),   # conv weights (3, C)
                pl.BlockSpec(memory_space=pltpu.MemorySpace.SMEM),   # conv bias (1, C)
                pl.BlockSpec((D, tb), lambda i: (0, i)),             # head  (D, Bp)
                pl.BlockSpec((D, tb), lambda i: (0, i)),             # rel   (D, Bp)
                pl.BlockSpec((D, tb), lambda i: (0, i)),             # tail  (D, Bp)
                pl.BlockSpec((D, C), lambda i: (0, 0)),              # fc weight (D, C)
            ],
            out_specs=pl.BlockSpec((1, tb), lambda i: (0, i)),       # lane-dense scores
        ),
        compiler_params=pltpu.CompilerParams(
            dimension_semantics=("parallel",)),
    )(conv_w_k, conv_b, h_t, r_t, t_t, fcw_t)


@functools.partial(jax.jit, static_argnames=("tb", "hbm_dtype"))
def spkbgat_conv_only_forward(params, batch_inputs, *, tb=256,
                              hbm_dtype=jnp.float32):
    """Embedding gather in XLA, ConvKB hot path in the Pallas kernel."""
    ent = params["final_entity_embeddings"]       # (num_nodes, D)
    rel = params["final_relation_embeddings"]     # (num_rel,  D)
    D = ent.shape[1]
    C = params["conv_w"].shape[0]
    B = batch_inputs.shape[0]

    # Pad the batch to a tile multiple (no tail triples silently dropped).
    n_tiles = pl.cdiv(B, tb)
    Bp = n_tiles * tb
    idx = jnp.pad(batch_inputs, ((0, Bp - B), (0, 0)))   # pad rows use index 0

    # Gather, then lay the batch on the lane (minor) axis. The HBM leg may be
    # bf16 (compute is f32 in-kernel).
    # TODO(synk): embedding gather still goes through an XLA gather + HBM round
    # trip; moving it in-kernel (VMEM-resident tables + scalar-prefetch indices)
    # would remove one HBM pass.
    h_t = ent[idx[:, 0], :].T.astype(hbm_dtype)   # (D, Bp)
    r_t = rel[idx[:, 1], :].T.astype(hbm_dtype)   # (D, Bp)
    t_t = ent[idx[:, 2], :].T.astype(hbm_dtype)   # (D, Bp)

    conv_w_k = params["conv_w"].reshape(C, 3).T.astype(jnp.float32)   # (3, C)
    conv_b = params["conv_b"].reshape(1, C).astype(jnp.float32)       # (1, C)
    # fc weight (1, C*D), row-major over (c, d) -> (C, D) -> transpose -> (D, C)
    fcw_t = params["fc_w"].reshape(C, D).T.astype(jnp.float32)        # (D, C)

    scores = convkb_pallas(conv_w_k, conv_b, h_t, r_t, t_t, fcw_t, tb=tb)  # (1, Bp)
    scores = scores[0, :B] + params["fc_b"].reshape(())   # fold fc bias post-kernel
    return scores.reshape(B, 1)


def reference_forward(params, batch_inputs):
    """Pure-JAX reference reproducing the PyTorch ConvKB math."""
    ent = params["final_entity_embeddings"]
    rel = params["final_relation_embeddings"]
    h = ent[batch_inputs[:, 0], :]
    r = rel[batch_inputs[:, 1], :]
    t = ent[batch_inputs[:, 2], :]
    x = jnp.stack([h, r, t], axis=1)              # (B, 3, D)
    C = params["conv_w"].shape[0]
    D = ent.shape[1]
    w = params["conv_w"].reshape(C, 3)            # (C, 3) over the seq axis
    conv = jnp.einsum("bkd,ck->bcd", x, w) + params["conv_b"].reshape(1, C, 1)
    act = jnp.maximum(conv, 0.0)
    flat = act.reshape(x.shape[0], C * D)         # C-major flatten (matches .view)
    return flat @ params["fc_w"].reshape(1, C * D).T + params["fc_b"].reshape(1, 1)


if __name__ == "__main__":
    key = jax.random.PRNGKey(0)
    ks = jax.random.split(key, 9)

    # Module hyper-params (consistent with SpKBGATConvOnly.__init__):
    num_nodes = 64
    num_relations = 11
    entity_out_dim_1 = 8
    nheads_GAT_1 = 4
    D = entity_out_dim_1 * nheads_GAT_1           # 32
    conv_out_channels = 8
    B = 600                                       # not a tile multiple -> exercises padding
    TB = 256                                      # tile size -> grid = (3,)

    params = {
        # nn.Parameter(torch.randn(...))
        "final_entity_embeddings": jax.random.normal(ks[0], (num_nodes, D), jnp.float32),
        "final_relation_embeddings": jax.random.normal(ks[1], (num_relations, D), jnp.float32),
        # ConvKB: Conv2d(1, C, (1, 3)) weight (C,1,1,3) + bias (C,)
        "conv_w": 0.1 * jax.random.normal(ks[2], (conv_out_channels, 1, 1, 3), jnp.float32),
        "conv_b": 0.1 * jax.random.normal(ks[3], (conv_out_channels,), jnp.float32),
        # ConvKB: Linear(D * C, 1)
        "fc_w": 0.1 * jax.random.normal(ks[4], (1, D * conv_out_channels), jnp.float32),
        "fc_b": 0.1 * jax.random.normal(ks[5], (1,), jnp.float32),
    }

    # batch_inputs: (B, 3) int triples [head, relation, tail]
    batch_inputs = jnp.stack([
        jax.random.randint(ks[6], (B,), 0, num_nodes),
        jax.random.randint(ks[7], (B,), 0, num_relations),
        jax.random.randint(ks[8], (B,), 0, num_nodes),
    ], axis=1).astype(jnp.int32)

    ref = reference_forward(params, batch_inputs)

    # f32 HBM leg (bit-faithful to the PyTorch module).
    out = spkbgat_conv_only_forward(params, batch_inputs, tb=TB, hbm_dtype=jnp.float32)
    out = jax.block_until_ready(out)
    assert out.shape == (B, 1), out.shape
    assert jnp.allclose(out, ref, atol=2e-4, rtol=1e-4), (out[:4], ref[:4])

    # bf16 HBM leg (halves HBM traffic; compute stays f32 in-kernel).
    out_bf16 = spkbgat_conv_only_forward(params, batch_inputs, tb=TB, hbm_dtype=jnp.bfloat16)
    out_bf16 = jax.block_until_ready(out_bf16)
    assert jnp.allclose(out_bf16, ref, atol=2e-2, rtol=2e-2), (out_bf16[:4], ref[:4])

    print("KERNEL_OK")
</pallas_src>

<mosaic_0001>
module attributes {stable_mosaic.version = 11 : i64} {
  func.func @convkb_kernel(%arg0: i32, %arg1: memref<3x8xf32, #tpu.memory_space<smem>>, %arg2: memref<1x8xf32, #tpu.memory_space<smem>>, %arg3: memref<32x256xf32, #tpu.memory_space<vmem>>, %arg4: memref<32x256xf32, #tpu.memory_space<vmem>>, %arg5: memref<32x256xf32, #tpu.memory_space<vmem>>, %arg6: memref<32x8xf32, #tpu.memory_space<vmem>>, %arg7: memref<1x256xf32, #tpu.memory_space<vmem>>) attributes {dimension_semantics = [#tpu.dimension_semantics<parallel>], iteration_bounds = array<i64: 3>, scalar_prefetch = 0 : i64, scratch_operands = 0 : i64, tpu.core_type = #tpu.core_type<tc>, window_params = [{transform_indices = @transform_0, window_bounds = array<i64: 3, 8>}, {transform_indices = @transform_1, window_bounds = array<i64: 1, 8>}, {transform_indices = @transform_2, window_bounds = array<i64: 32, 256>}, {transform_indices = @transform_3, window_bounds = array<i64: 32, 256>}, {transform_indices = @transform_4, window_bounds = array<i64: 32, 256>}, {pipeline_mode = #tpu.pipeline_mode<synchronous>, transform_indices = @transform_5, window_bounds = array<i64: 32, 8>}, {transform_indices = @transform_6, window_bounds = array<i64: 1, 256>}]} {
    %c0 = arith.constant 0 : index
    %c0_0 = arith.constant 0 : index
    %0 = vector.load %arg3[%c0, %c0_0] : memref<32x256xf32, #tpu.memory_space<vmem>>, vector<32x256xf32>
    %c0_1 = arith.constant 0 : index
    %c0_2 = arith.constant 0 : index
    %1 = vector.load %arg4[%c0_1, %c0_2] : memref<32x256xf32, #tpu.memory_space<vmem>>, vector<32x256xf32>
    %c0_3 = arith.constant 0 : index
    %c0_4 = arith.constant 0 : index
    %2 = vector.load %arg5[%c0_3, %c0_4] : memref<32x256xf32, #tpu.memory_space<vmem>>, vector<32x256xf32>
    %c0_5 = arith.constant 0 : index
    %c0_6 = arith.constant 0 : index
    %3 = vector.load %arg6[%c0_5, %c0_6] : memref<32x8xf32, #tpu.memory_space<vmem>>, vector<32x8xf32>
    %cst = arith.constant 0.000000e+00 : f32
    %4 = vector.broadcast %cst : f32 to vector<32x256xf32>
    %c0_7 = arith.constant 0 : index
    %c0_8 = arith.constant 0 : index
    %5 = memref.load %arg1[%c0_7, %c0_8] : memref<3x8xf32, #tpu.memory_space<smem>>
    %6 = vector.broadcast %5 : f32 to vector<32x256xf32>
    %7 = arith.mulf %6, %0 : vector<32x256xf32>
    %c1 = arith.constant 1 : index
    %c0_9 = arith.constant 0 : index
    %8 = memref.load %arg1[%c1, %c0_9] : memref<3x8xf32, #tpu.memory_space<smem>>
    %9 = vector.broadcast %8 : f32 to vector<32x256xf32>
    %10 = arith.mulf %9, %1 : vector<32x256xf32>
    %11 = arith.addf %7, %10 : vector<32x256xf32>
    %c2 = arith.constant 2 : index
    %c0_10 = arith.constant 0 : index
    %12 = memref.load %arg1[%c2, %c0_10] : memref<3x8xf32, #tpu.memory_space<smem>>
    %13 = vector.broadcast %12 : f32 to vector<32x256xf32>
    %14 = arith.mulf %13, %2 : vector<32x256xf32>
    %15 = arith.addf %11, %14 : vector<32x256xf32>
    %c0_11 = arith.constant 0 : index
    %c0_12 = arith.constant 0 : index
    %16 = memref.load %arg2[%c0_11, %c0_12] : memref<1x8xf32, #tpu.memory_space<smem>>
    %17 = vector.broadcast %16 : f32 to vector<32x256xf32>
    %18 = arith.addf %15, %17 : vector<32x256xf32>
    %cst_13 = arith.constant 0.000000e+00 : f32
    %19 = vector.broadcast %cst_13 : f32 to vector<32x256xf32>
    %20 = arith.maximumf %18, %19 : vector<32x256xf32>
    %21 = vector.extract_strided_slice %3 {offsets = [0, 0], sizes = [32, 1], strides = [1, 1]} : vector<32x8xf32> to vector<32x1xf32>
    %22 = vector.broadcast %21 : vector<32x1xf32> to vector<32x256xf32>
    %23 = arith.mulf %22, %20 : vector<32x256xf32>
    %24 = arith.addf %4, %23 : vector<32x256xf32>
    %c0_14 = arith.constant 0 : index
    %c1_15 = arith.constant 1 : index
    %25 = memref.load %arg1[%c0_14, %c1_15] : memref<3x8xf32, #tpu.memory_space<smem>>
    %26 = vector.broadcast %25 : f32 to vector<32x256xf32>
    %27 = arith.mulf %26, %0 : vector<32x256xf32>
    %c1_16 = arith.constant 1 : index
    %c1_17 = arith.constant 1 : index
    %28 = memref.load %arg1[%c1_16, %c1_17] : memref<3x8xf32, #tpu.memory_space<smem>>
    %29 = vector.broadcast %28 : f32 to vector<32x256xf32>
    %30 = arith.mulf %29, %1 : vector<32x256xf32>
    %31 = arith.addf %27, %30 : vector<32x256xf32>
    %c2_18 = arith.constant 2 : index
    %c1_19 = arith.constant 1 : index
    %32 = memref.load %arg1[%c2_18, %c1_19] : memref<3x8xf32, #tpu.memory_space<smem>>
    %33 = vector.broadcast %32 : f32 to vector<32x256xf32>
    %34 = arith.mulf %33, %2 : vector<32x256xf32>
    %35 = arith.addf %31, %34 : vector<32x256xf32>
    %c0_20 = arith.constant 0 : index
    %c1_21 = arith.constant 1 : index
    %36 = memref.load %arg2[%c0_20, %c1_21] : memref<1x8xf32, #tpu.memory_space<smem>>
    %37 = vector.broadcast %36 : f32 to vector<32x256xf32>
    %38 = arith.addf %35, %37 : vector<32x256xf32>
    %cst_22 = arith.constant 0.000000e+00 : f32
    %39 = vector.broadcast %cst_22 : f32 to vector<32x256xf32>
    %40 = arith.maximumf %38, %39 : vector<32x256xf32>
    %41 = vector.extract_strided_slice %3 {offsets = [0, 1], sizes = [32, 1], strides = [1, 1]} : vector<32x8xf32> to vector<32x1xf32>
    %42 = vector.broadcast %41 : vector<32x1xf32> to vector<32x256xf32>
    %43 = arith.mulf %42, %40 : vector<32x256xf32>
    %44 = arith.addf %24, %43 : vector<32x256xf32>
    %c0_23 = arith.constant 0 : index
    %c2_24 = arith.constant 2 : index
    %45 = memref.load %arg1[%c0_23, %c2_24] : memref<3x8xf32, #tpu.memory_space<smem>>
    %46 = vector.broadcast %45 : f32 to vector<32x256xf32>
    %47 = arith.mulf %46, %0 : vector<32x256xf32>
    %c1_25 = arith.constant 1 : index
    %c2_26 = arith.constant 2 : index
    %48 = memref.load %arg1[%c1_25, %c2_26] : memref<3x8xf32, #tpu.memory_space<smem>>
    %49 = vector.broadcast %48 : f32 to vector<32x256xf32>
    %50 = arith.mulf %49, %1 : vector<32x256xf32>
    %51 = arith.addf %47, %50 : vector<32x256xf32>
    %c2_27 = arith.constant 2 : index
    %c2_28 = arith.constant 2 : index
    %52 = memref.load %arg1[%c2_27, %c2_28] : memref<3x8xf32, #tpu.memory_space<smem>>
    %53 = vector.broadcast %52 : f32 to vector<32x256xf32>
    %54 = arith.mulf %53, %2 : vector<32x256xf32>
    %55 = arith.addf %51, %54 : vector<32x256xf32>
    %c0_29 = arith.constant 0 : index
    %c2_30 = arith.constant 2 : index
    %56 = memref.load %arg2[%c0_29, %c2_30] : memref<1x8xf32, #tpu.memory_space<smem>>
    %57 = vector.broadcast %56 : f32 to vector<32x256xf32>
    %58 = arith.addf %55, %57 : vector<32x256xf32>
    %cst_31 = arith.constant 0.000000e+00 : f32
    %59 = vector.broadcast %cst_31 : f32 to vector<32x256xf32>
    %60 = arith.maximumf %58, %59 : vector<32x256xf32>
    %61 = vector.extract_strided_slice %3 {offsets = [0, 2], sizes = [32, 1], strides = [1, 1]} : vector<32x8xf32> to vector<32x1xf32>
    %62 = vector.broadcast %61 : vector<32x1xf32> to vector<32x256xf32>
    %63 = arith.mulf %62, %60 : vector<32x256xf32>
    %64 = arith.addf %44, %63 : vector<32x256xf32>
    %c0_32 = arith.constant 0 : index
    %c3 = arith.constant 3 : index
    %65 = memref.load %arg1[%c0_32, %c3] : memref<3x8xf32, #tpu.memory_space<smem>>
    %66 = vector.broadcast %65 : f32 to vector<32x256xf32>
    %67 = arith.mulf %66, %0 : vector<32x256xf32>
    %c1_33 = arith.constant 1 : index
    %c3_34 = arith.constant 3 : index
    %68 = memref.load %arg1[%c1_33, %c3_34] : memref<3x8xf32, #tpu.memory_space<smem>>
    %69 = vector.broadcast %68 : f32 to vector<32x256xf32>
    %70 = arith.mulf %69, %1 : vector<32x256xf32>
    %71 = arith.addf %67, %70 : vector<32x256xf32>
    %c2_35 = arith.constant 2 : index
    %c3_36 = arith.constant 3 : index
    %72 = memref.load %arg1[%c2_35, %c3_36] : memref<3x8xf32, #tpu.memory_space<smem>>
    %73 = vector.broadcast %72 : f32 to vector<32x256xf32>
    %74 = arith.mulf %73, %2 : vector<32x256xf32>
    %75 = arith.addf %71, %74 : vector<32x256xf32>
    %c0_37 = arith.constant 0 : index
    %c3_38 = arith.constant 3 : index
    %76 = memref.load %arg2[%c0_37, %c3_38] : memref<1x8xf32, #tpu.memory_space<smem>>
    %77 = vector.broadcast %76 : f32 to vector<32x256xf32>
    %78 = arith.addf %75, %77 : vector<32x256xf32>
    %cst_39 = arith.constant 0.000000e+00 : f32
    %79 = vector.broadcast %cst_39 : f32 to vector<32x256xf32>
    %80 = arith.maximumf %78, %79 : vector<32x256xf32>
    %81 = vector.extract_strided_slice %3 {offsets = [0, 3], sizes = [32, 1], strides = [1, 1]} : vector<32x8xf32> to vector<32x1xf32>
    %82 = vector.broadcast %81 : vector<32x1xf32> to vector<32x256xf32>
    %83 = arith.mulf %82, %80 : vector<32x256xf32>
    %84 = arith.addf %64, %83 : vector<32x256xf32>
    %c0_40 = arith.constant 0 : index
    %c4 = arith.constant 4 : index
    %85 = memref.load %arg1[%c0_40, %c4] : memref<3x8xf32, #tpu.memory_space<smem>>
    %86 = vector.broadcast %85 : f32 to vector<32x256xf32>
    %87 = arith.mulf %86, %0 : vector<32x256xf32>
    %c1_41 = arith.constant 1 : index
    %c4_42 = arith.constant 4 : index
    %88 = memref.load %arg1[%c1_41, %c4_42] : memref<3x8xf32, #tpu.memory_space<smem>>
    %89 = vector.broadcast %88 : f32 to vector<32x256xf32>
    %90 = arith.mulf %89, %1 : vector<32x256xf32>
    %91 = arith.addf %87, %90 : vector<32x256xf32>
    %c2_43 = arith.constant 2 : index
    %c4_44 = arith.constant 4 : index
    %92 = memref.load %arg1[%c2_43, %c4_44] : memref<3x8xf32, #tpu.memory_space<smem>>
    %93 = vector.broadcast %92 : f32 to vector<32x256xf32>
    %94 = arith.mulf %93, %2 : vector<32x256xf32>
    %95 = arith.addf %91, %94 : vector<32x256xf32>
    %c0_45 = arith.constant 0 : index
    %c4_46 = arith.constant 4 : index
    %96 = memref.load %arg2[%c0_45, %c4_46] : memref<1x8xf32, #tpu.memory_space<smem>>
    %97 = vector.broadcast %96 : f32 to vector<32x256xf32>
    %98 = arith.addf %95, %97 : vector<32x256xf32>
    %cst_47 = arith.constant 0.000000e+00 : f32
    %99 = vector.broadcast %cst_47 : f32 to vector<32x256xf32>
    %100 = arith.maximumf %98, %99 : vector<32x256xf32>
    %101 = vector.extract_strided_slice %3 {offsets = [0, 4], sizes = [32, 1], strides = [1, 1]} : vector<32x8xf32> to vector<32x1xf32>
    %102 = vector.broadcast %101 : vector<32x1xf32> to vector<32x256xf32>
    %103 = arith.mulf %102, %100 : vector<32x256xf32>
    %104 = arith.addf %84, %103 : vector<32x256xf32>
    %c0_48 = arith.constant 0 : index
    %c5 = arith.constant 5 : index
    %105 = memref.load %arg1[%c0_48, %c5] : memref<3x8xf32, #tpu.memory_space<smem>>
    %106 = vector.broadcast %105 : f32 to vector<32x256xf32>
    %107 = arith.mulf %106, %0 : vector<32x256xf32>
    %c1_49 = arith.constant 1 : index
    %c5_50 = arith.constant 5 : index
    %108 = memref.load %arg1[%c1_49, %c5_50] : memref<3x8xf32, #tpu.memory_space<smem>>
    %109 = vector.broadcast %108 : f32 to vector<32x256xf32>
    %110 = arith.mulf %109, %1 : vector<32x256xf32>
    %111 = arith.addf %107, %110 : vector<32x256xf32>
    %c2_51 = arith.constant 2 : index
    %c5_52 = arith.constant 5 : index
    %112 = memref.load %arg1[%c2_51, %c5_52] : memref<3x8xf32, #tpu.memory_space<smem>>
    %113 = vector.broadcast %112 : f32 to vector<32x256xf32>
    %114 = arith.mulf %113, %2 : vector<32x256xf32>
    %115 = arith.addf %111, %114 : vector<32x256xf32>
    %c0_53 = arith.constant 0 : index
    %c5_54 = arith.constant 5 : index
    %116 = memref.load %arg2[%c0_53, %c5_54] : memref<1x8xf32, #tpu.memory_space<smem>>
    %117 = vector.broadcast %116 : f32 to vector<32x256xf32>
    %118 = arith.addf %115, %117 : vector<32x256xf32>
    %cst_55 = arith.constant 0.000000e+00 : f32
    %119 = vector.broadcast %cst_55 : f32 to vector<32x256xf32>
    %120 = arith.maximumf %118, %119 : vector<32x256xf32>
    %121 = vector.extract_strided_slice %3 {offsets = [0, 5], sizes = [32, 1], strides = [1, 1]} : vector<32x8xf32> to vector<32x1xf32>
    %122 = vector.broadcast %121 : vector<32x1xf32> to vector<32x256xf32>
    %123 = arith.mulf %122, %120 : vector<32x256xf32>
    %124 = arith.addf %104, %123 : vector<32x256xf32>
    %c0_56 = arith.constant 0 : index
    %c6 = arith.constant 6 : index
    %125 = memref.load %arg1[%c0_56, %c6] : memref<3x8xf32, #tpu.memory_space<smem>>
    %126 = vector.broadcast %125 : f32 to vector<32x256xf32>
    %127 = arith.mulf %126, %0 : vector<32x256xf32>
    %c1_57 = arith.constant 1 : index
    %c6_58 = arith.constant 6 : index
    %128 = memref.load %arg1[%c1_57, %c6_58] : memref<3x8xf32, #tpu.memory_space<smem>>
    %129 = vector.broadcast %128 : f32 to vector<32x256xf32>
    %130 = arith.mulf %129, %1 : vector<32x256xf32>
    %131 = arith.addf %127, %130 : vector<32x256xf32>
    %c2_59 = arith.constant 2 : index
    %c6_60 = arith.constant 6 : index
    %132 = memref.load %arg1[%c2_59, %c6_60] : memref<3x8xf32, #tpu.memory_space<smem>>
    %133 = vector.broadcast %132 : f32 to vector<32x256xf32>
    %134 = arith.mulf %133, %2 : vector<32x256xf32>
    %135 = arith.addf %131, %134 : vector<32x256xf32>
    %c0_61 = arith.constant 0 : index
    %c6_62 = arith.constant 6 : index
    %136 = memref.load %arg2[%c0_61, %c6_62] : memref<1x8xf32, #tpu.memory_space<smem>>
    %137 = vector.broadcast %136 : f32 to vector<32x256xf32>
    %138 = arith.addf %135, %137 : vector<32x256xf32>
    %cst_63 = arith.constant 0.000000e+00 : f32
    %139 = vector.broadcast %cst_63 : f32 to vector<32x256xf32>
    %140 = arith.maximumf %138, %139 : vector<32x256xf32>
    %141 = vector.extract_strided_slice %3 {offsets = [0, 6], sizes = [32, 1], strides = [1, 1]} : vector<32x8xf32> to vector<32x1xf32>
    %142 = vector.broadcast %141 : vector<32x1xf32> to vector<32x256xf32>
    %143 = arith.mulf %142, %140 : vector<32x256xf32>
    %144 = arith.addf %124, %143 : vector<32x256xf32>
    %c0_64 = arith.constant 0 : index
    %c7 = arith.constant 7 : index
    %145 = memref.load %arg1[%c0_64, %c7] : memref<3x8xf32, #tpu.memory_space<smem>>
    %146 = vector.broadcast %145 : f32 to vector<32x256xf32>
    %147 = arith.mulf %146, %0 : vector<32x256xf32>
    %c1_65 = arith.constant 1 : index
    %c7_66 = arith.constant 7 : index
    %148 = memref.load %arg1[%c1_65, %c7_66] : memref<3x8xf32, #tpu.memory_space<smem>>
    %149 = vector.broadcast %148 : f32 to vector<32x256xf32>
    %150 = arith.mulf %149, %1 : vector<32x256xf32>
    %151 = arith.addf %147, %150 : vector<32x256xf32>
    %c2_67 = arith.constant 2 : index
    %c7_68 = arith.constant 7 : index
    %152 = memref.load %arg1[%c2_67, %c7_68] : memref<3x8xf32, #tpu.memory_space<smem>>
    %153 = vector.broadcast %152 : f32 to vector<32x256xf32>
    %154 = arith.mulf %153, %2 : vector<32x256xf32>
    %155 = arith.addf %151, %154 : vector<32x256xf32>
    %c0_69 = arith.constant 0 : index
    %c7_70 = arith.constant 7 : index
    %156 = memref.load %arg2[%c0_69, %c7_70] : memref<1x8xf32, #tpu.memory_space<smem>>
    %157 = vector.broadcast %156 : f32 to vector<32x256xf32>
    %158 = arith.addf %155, %157 : vector<32x256xf32>
    %cst_71 = arith.constant 0.000000e+00 : f32
    %159 = vector.broadcast %cst_71 : f32 to vector<32x256xf32>
    %160 = arith.maximumf %158, %159 : vector<32x256xf32>
    %161 = vector.extract_strided_slice %3 {offsets = [0, 7], sizes = [32, 1], strides = [1, 1]} : vector<32x8xf32> to vector<32x1xf32>
    %162 = vector.broadcast %161 : vector<32x1xf32> to vector<32x256xf32>
    %163 = arith.mulf %162, %160 : vector<32x256xf32>
    %164 = arith.addf %144, %163 : vector<32x256xf32>
    %cst_72 = arith.constant dense<0.000000e+00> : vector<256xf32>
    %165 = vector.multi_reduction <add>, %164, %cst_72 [0] : vector<32x256xf32> to vector<256xf32>
    %166 = vector.shape_cast %165 : vector<256xf32> to vector<1x256xf32>
    %c0_73 = arith.constant 0 : index
    %c0_74 = arith.constant 0 : index
    %167 = vector.load %arg7[%c0_73, %c0_74] : memref<1x256xf32, #tpu.memory_space<vmem>>, vector<1x256xf32>
    tpu.vector_store %arg7[%c0_73, %c0_74], %166 {strides = array<i32>} : memref<1x256xf32, #tpu.memory_space<vmem>>, vector<1x256xf32>,
    return
  }
  func.func @transform_0(%arg0: i32) -> (i32, i32) {
    %c0_i32 = arith.constant 0 : i32
    %c0_i32_0 = arith.constant 0 : i32
    %c0_i32_1 = arith.constant 0 : i32
    return %c0_i32, %c0_i32_0 : i32, i32
  }
  func.func @transform_1(%arg0: i32) -> (i32, i32) {
    %c0_i32 = arith.constant 0 : i32
    %c0_i32_0 = arith.constant 0 : i32
    %c0_i32_1 = arith.constant 0 : i32
    return %c0_i32, %c0_i32_0 : i32, i32
  }
  func.func @transform_2(%arg0: i32) -> (i32, i32) {
    %c0_i32 = arith.constant 0 : i32
    %c0_i32_0 = arith.constant 0 : i32
    return %c0_i32, %arg0 : i32, i32
  }
  func.func @transform_3(%arg0: i32) -> (i32, i32) {
    %c0_i32 = arith.constant 0 : i32
    %c0_i32_0 = arith.constant 0 : i32
    return %c0_i32, %arg0 : i32, i32
  }
  func.func @transform_4(%arg0: i32) -> (i32, i32) {
    %c0_i32 = arith.constant 0 : i32
    %c0_i32_0 = arith.constant 0 : i32
    return %c0_i32, %arg0 : i32, i32
  }
  func.func @transform_5(%arg0: i32) -> (i32, i32) {
    %c0_i32 = arith.constant 0 : i32
    %c0_i32_0 = arith.constant 0 : i32
    %c0_i32_1 = arith.constant 0 : i32
    return %c0_i32, %c0_i32_0 : i32, i32
  }
  func.func @transform_6(%arg0: i32) -> (i32, i32) {
    %c0_i32 = arith.constant 0 : i32
    %c0_i32_0 = arith.constant 0 : i32
    return %c0_i32, %arg0 : i32, i32
  }
}

</mosaic_0001>

<bundles_post_ra>
// kernel: spkbgat_conv_only_forward.1
= control target key start
LH: loop header
LB: loop body
LE: loop exit
PB: predicated region body
PF: predicated region fallthrough
CT: control target
= control target key end

     0   :  { %11 = vsyncpa [#allocation3], 0  ;;  %s2884_s0 = inlined_call_operand.vmem [shape: f32[3,8], index: 0, kind: input, shape index: {}]   ;;  %s2885_s1 = inlined_call_operand.vmem [shape: f32[1,8], index: 1, kind: input, shape index: {}]   ;;  %s2886_s2 = inlined_call_operand.vmem [shape: f32[32,768], index: 2, kind: input, shape index: {}]   ;;  %s2887_s3 = inlined_call_operand.vmem [shape: f32[32,768], index: 3, kind: input, shape index: {}]   ;;  %s2888_s4 = inlined_call_operand.vmem [shape: f32[32,768], index: 4, kind: input, shape index: {}]   ;;  %s2889_s5 = inlined_call_operand.vmem [shape: f32[32,8], index: 5, kind: input, shape index: {}]   ;;  %s2890_s6 = inlined_call_operand.vmem [shape: f32[1,768], index: 6, kind: output, shape index: {}]  }
   0x1   :  { %12 = vsyncpa [#allocation5], 0  ;;  %s1628_s21 = smov 0   ;;  %s1630_s22 = smov 0  }
   0x2   :  { %s1632_s23 = smov 0  }
   0x3 LB: > { %s1378_s24 = sadd.s32 4294967295, %s1580_s23   ;;  %s1645_s25 = sadd.s32 1, %s1580_s23   ;;  %s1580_s23 = sphi %s1632_s23, %s3136_s23   ;;  %s1576_s22 = sphi %s1630_s22, %s3135_s22   ;;  %s1572_s21 = sphi %s1628_s21, %s3134_s21  }
   0x4   : > { %s64_s26 = ssub.s32 %s1580_s23, %s1645_s25  ;;  %s67_s27 = sadd.s32 1, %s1576_s22 }
   0x5   : > { %p65_p0 = scmp.eq.s32.totalorder %s64_s26, 0  ;;  %p74_p1 = scmp.ne.s32.totalorder %s1576_s22, %s1572_s21 }
   0x6   : > { %p75_p2 = scmp.eq.s32.totalorder %s1580_s23, 0  ;;  %p1380_p3 = scmp.ge.s32.totalorder %s1580_s23, 1 }
   0x7   : > { %s1655_s28 = scalar_select %p65_p0, %s1576_s22, %s67_s27  }
   0x8   : > { %p1657_p4 = por %p75_p2, %p74_p1  ;;  %p190_p5 = scmp.lt.s32.totalorder %s1580_s23, 4 }
   0x9   : > { %p1664_p6 = scmp.eq.s32.totalorder %s1378_s24, 0  ;;  %s203_s10 = sshll.u32 %s2884_s0, 4  ;;  %s204_s10 = int_to_ptr.vmem [resolvable:$true] %s203_s10 }
   0xa   : > { %s2953_s29 = scalar_select %p1657_p4, 1, 0 }
   0xb   : > { %s2954_s30 = scalar_select %p1664_p6, 1, 0 }
   0xc   : > { %p1668_p7 = pnand %p1380_p3, %p190_p5  ;;  %s214_s13 = sshll.u32 %s2885_s1, 4  ;;  %s215_s13 = int_to_ptr.vmem [resolvable:$true] %s214_s13 }
   0xd   : > { %s1520_s15 = scalar_lea.vmem %s204_s10, 64  ;;  %p1528_p0 = scmp.lt.s32.totalorder %s204_s10, %s204_s10 }
   0xe   : > { %s2955_s7 = scalar_select %p1668_p7, 1, 0 }
   0xf   : > { %p1443_p8 = pneg %p1668_p7  ;;  %p1521_p10 = scmp.ne.s32.totalorder %s204_s10, %s1520_s15 }
  0x10   : > { %p1529_p1 = scmp.lt.s32.totalorder %s1520_s15, %s1520_s15 }
  0x11   : > { %p1682_p9 = pnand %p1664_p6, %p1443_p8 }
  0x12   : > { %p1530_p2 = por %p1529_p1, %p1528_p0 }
  0x13   : > { %p1522_p11 = pneg %p1682_p9 }
  0x15   : > { %p1523_p12 = pnand %p1522_p11, %p1521_p10 }
  0x17   : > { %p1524_p13 = pneg %p1523_p12 }
  0x19   : > { %p1531_p3 = pnand %p1530_p2, %p1524_p13 }
  0x1b   : > { %1534 = shalt.err (!%p1531_p3)
}
  0x1c   : > { %s1582_s16 = smov [#allocation2]   ;;  %s1535_s17 = scalar_lea.vmem %s215_s13, 16 }
  0x1d   : > { %1446 = dma.vmem_to_smem (!%p1682_p9), %s204_s10, 64, %s1582_s16, [#allocation3]  }
  0x1e   : > { %p1536_p5 = scmp.ne.s32.totalorder %s215_s13, %s1535_s17  ;;  %p1543_p7 = scmp.lt.s32.totalorder %s215_s13, %s215_s13 }
  0x1f   : > { %p1544_p4 = scmp.lt.s32.totalorder %s1535_s17, %s1535_s17 }
  0x20   : > { %p1538_p8 = pnand %p1536_p5, %p1522_p11 }
  0x21   : > { %p1545_p10 = por %p1544_p4, %p1543_p7 }
  0x22   : > { %p1539_p6 = pneg %p1538_p8 }
  0x24   : > { %p1546_p12 = pnand %p1545_p10, %p1539_p6 }
  0x26   : > { %1549 = shalt.err (!%p1546_p12)
}
  0x27   : > { %s1583_s18 = smov [#allocation4]   ;;  %p1383_p13 = scmp.ge.s32.totalorder %s1580_s23, 3 }
  0x28   : > { %1449 = dma.vmem_to_smem (!%p1682_p9), %s215_s13, 16, %s1583_s18, [#allocation5]  }
  0x29   : > { %224 = sbr.rel (%p1383_p13) target bundleno = 72 (0x48), region = 28  ;;  %p2957_p0 = scmp.ne.s32.totalorder (!%p1383_p13), %s2953_s29, 0 }
  0x2e   : > { %227 = sbr.rel (!%p2957_p0) target bundleno = 54 (0x36), region = 32  ;;  %s229_s19 = sand.u32 (%p2957_p0), 1, %s1576_s22  }
  0x2f   : > { %s1432_s20 = sshll.u32 (%p2957_p0), %s1580_s23, 4  ;;  %s1384_s26 = sshll.u32 (%p2957_p0), %s229_s19, 6 }
  0x30   : > { %s234_s9 = scalar_lea.vmem (%p2957_p0), %s2886_s2, %s1432_s20  ;;  %s231_s10 = scalar_lea.vmem (%p2957_p0), [#allocation6], %s1384_s26 }
  0x31   : > { %v247_v0 = vld [vmem:[%s234_s9] sm:$0xff] (%p2957_p0)  ;;  %v249_v1 = vld [vmem:[%s234_s9 + $0x8] sm:$0xff] (%p2957_p0)  ;;  %v251_v2 = vld [vmem:[%s234_s9 + $0x30] sm:$0xff] (%p2957_p0) }
  0x32   : > { %248 = vst [vmem:[%s231_s10] sm:$0xff] (%p2957_p0), %v247_v0  ;;  %250 = vst [vmem:[%s231_s10 + $0x8] sm:$0xff] (%p2957_p0), %v249_v1  ;;  %v253_v3 = vld [vmem:[%s234_s9 + $0x38] sm:$0xff] (%p2957_p0)  ;;  %v255_v4 = vld [vmem:[%s234_s9 + $0x60] sm:$0xff] (%p2957_p0) }
  0x33   : > { %252 = vst [vmem:[%s231_s10 + $0x10] sm:$0xff] %v251_v2  ;;  %v257_v5 = vld [vmem:[%s234_s9 + $0x68] sm:$0xff]  ;;  %254 = vst [vmem:[%s231_s10 + $0x18] sm:$0xff] %v253_v3  ;;  %v259_v6 = vld [vmem:[%s234_s9 + $0x90] sm:$0xff] }
  0x34   : > { %256 = vst [vmem:[%s231_s10 + $0x20] sm:$0xff] %v255_v4  ;;  %258 = vst [vmem:[%s231_s10 + $0x28] sm:$0xff] %v257_v5  ;;  %v261_v7 = vld [vmem:[%s234_s9 + $0x98] sm:$0xff] }
  0x35   : > { %260 = vst [vmem:[%s231_s10 + $0x30] sm:$0xff] %v259_v6  ;;  %262 = vst [vmem:[%s231_s10 + $0x38] sm:$0xff] %v261_v7 }
  0x36 PF: > { %p2958_p4 = scmp.ne.s32.totalorder %s2953_s29, 0 }
  0x37   : > { %s270_s11 = sand.u32 (%p2958_p4), 1, %s1576_s22   ;;  %s1433_s12 = sshll.u32 (%p2958_p4), %s1580_s23, 4 }
  0x38   : > { %268 = sbr.rel (!%p2958_p4) target bundleno = 63 (0x3f), region = 55  ;;  %s1387_s13 = sshll.u32 (%p2958_p4), %s270_s11, 6 }
  0x39   : > { %s275_s16 = scalar_lea.vmem (%p2958_p4), %s2887_s3, %s1433_s12  ;;  %s272_s17 = scalar_lea.vmem (%p2958_p4), [#allocation7], %s1387_s13 }
  0x3a   : > { %v288_v8 = vld [vmem:[%s275_s16] sm:$0xff] (%p2958_p4)  ;;  %v290_v9 = vld [vmem:[%s275_s16 + $0x8] sm:$0xff] (%p2958_p4)  ;;  %v292_v10 = vld [vmem:[%s275_s16 + $0x30] sm:$0xff] (%p2958_p4) }
  0x3b   : > { %289 = vst [vmem:[%s272_s17] sm:$0xff] (%p2958_p4), %v288_v8  ;;  %291 = vst [vmem:[%s272_s17 + $0x8] sm:$0xff] (%p2958_p4), %v290_v9  ;;  %v294_v11 = vld [vmem:[%s275_s16 + $0x38] sm:$0xff] (%p2958_p4)  ;;  %v296_v12 = vld [vmem:[%s275_s16 + $0x60] sm:$0xff] (%p2958_p4) }
  0x3c   : > { %293 = vst [vmem:[%s272_s17 + $0x10] sm:$0xff] (%p2958_p4), %v292_v10  ;;  %v298_v13 = vld [vmem:[%s275_s16 + $0x68] sm:$0xff] (%p2958_p4)  ;;  %295 = vst [vmem:[%s272_s17 + $0x18] sm:$0xff] (%p2958_p4), %v294_v11  ;;  %v300_v14 = vld [vmem:[%s275_s16 + $0x90] sm:$0xff] (%p2958_p4) }
  0x3d   : > { %297 = vst [vmem:[%s272_s17 + $0x20] sm:$0xff] %v296_v12  ;;  %299 = vst [vmem:[%s272_s17 + $0x28] sm:$0xff] %v298_v13  ;;  %v302_v15 = vld [vmem:[%s275_s16 + $0x98] sm:$0xff] }
  0x3e   : > { %301 = vst [vmem:[%s272_s17 + $0x30] sm:$0xff] %v300_v14  ;;  %303 = vst [vmem:[%s272_s17 + $0x38] sm:$0xff] %v302_v15 }
  0x3f PF: > { %p2959_p6 = scmp.ne.s32.totalorder %s2953_s29, 0 }
  0x40   : > { %s311_s18 = sand.u32 (%p2959_p6), 1, %s1576_s22   ;;  %s1434_s19 = sshll.u32 (%p2959_p6), %s1580_s23, 4 }
  0x41   : > { %309 = sbr.rel (!%p2959_p6) target bundleno = 72 (0x48), region = 78  ;;  %s1390_s20 = sshll.u32 (%p2959_p6), %s311_s18, 6 }
  0x42   : > { %s316_s8 = scalar_lea.vmem (%p2959_p6), %s2888_s4, %s1434_s19  ;;  %s313_s9 = scalar_lea.vmem (%p2959_p6), [#allocation8], %s1390_s20 }
  0x43   : > { %v329_v16 = vld [vmem:[%s316_s8] sm:$0xff] (%p2959_p6)  ;;  %v331_v17 = vld [vmem:[%s316_s8 + $0x8] sm:$0xff] (%p2959_p6)  ;;  %v333_v18 = vld [vmem:[%s316_s8 + $0x30] sm:$0xff] (%p2959_p6) }
  0x44   : > { %330 = vst [vmem:[%s313_s9] sm:$0xff] (%p2959_p6), %v329_v16  ;;  %332 = vst [vmem:[%s313_s9 + $0x8] sm:$0xff] (%p2959_p6), %v331_v17  ;;  %v335_v19 = vld [vmem:[%s316_s8 + $0x38] sm:$0xff] (%p2959_p6)  ;;  %v337_v20 = vld [vmem:[%s316_s8 + $0x60] sm:$0xff] (%p2959_p6) }
  0x45   : > { %334 = vst [vmem:[%s313_s9 + $0x10] sm:$0xff] (%p2959_p6), %v333_v18  ;;  %v339_v21 = vld [vmem:[%s316_s8 + $0x68] sm:$0xff] (%p2959_p6)  ;;  %336 = vst [vmem:[%s313_s9 + $0x18] sm:$0xff] (%p2959_p6), %v335_v19  ;;  %v341_v22 = vld [vmem:[%s316_s8 + $0x90] sm:$0xff] (%p2959_p6) }
  0x46   : > { %338 = vst [vmem:[%s313_s9 + $0x20] sm:$0xff] %v337_v20  ;;  %340 = vst [vmem:[%s313_s9 + $0x28] sm:$0xff] %v339_v21  ;;  %v343_v23 = vld [vmem:[%s316_s8 + $0x98] sm:$0xff] }
  0x47   : > { %342 = vst [vmem:[%s313_s9 + $0x30] sm:$0xff] %v341_v22  ;;  %344 = vst [vmem:[%s313_s9 + $0x38] sm:$0xff] %v343_v23 }
  0x48 PF: > { %p2960_p7 = scmp.ne.s32.totalorder %s2955_s7, 0 }
  0x4a   : > { %353 = sbr.rel (%p2960_p7) target bundleno = 333 (0x14d), region = 101 }
  0x4f   : > { %p2961_p9 = scmp.ne.s32.totalorder %s2954_s30, 0 }
  0x51   : > { %1563 = dma.done.wait (%p2961_p9), [#allocation3], 64  }
  0x52   : > { %1565 = vsyncadd (%p2961_p9), [#allocation3], 4294967232 }
  0x53   : > { %1567 = dma.done.wait (%p2961_p9), [#allocation5], 16  }
  0x54   : > { %1569 = vsyncadd (%p2961_p9), [#allocation5], 4294967280  ;;  %s364_s29 = sand.u32 1, %s1572_s21  }
  0x55   : > { %s1396_s10 = sshll.u32 %s364_s29, 6 }
  0x56   : > { %s1725_s11 = scalar_lea.vmem [#allocation6], %s1396_s10  ;;  %s1727_s12 = scalar_lea.vmem [#allocation7], %s1396_s10 }
  0x57   : > { %s1729_s7 = scalar_lea.vmem [#allocation8], %s1396_s10 }
  0x58   : > { %384 = sfence }
  0x59   : > { %v1734_v24 = vld [vmem:[%s2889_s5 + $0x10] sm:$0xff]  ;;  %v1739_v25 = vld [vmem:[%s2889_s5] sm:$0xff]  ;;  %v1584_v26 = vmov 0   ;;  %v1746_v27 = vld [vmem:[%s2889_s5 + $0x18] sm:$0xff]  ;;  %v1585_v29 = vmov 1   ;;  %v1586_v30 = vmov 2  }
  0x5a   : > { %1490 = vset.pattern.permute.xlu1 %v1584_v26  ;;  %1489 = vset.pattern.permute.xlu0 %v1584_v26  ;;  %v1751_v28 = vld [vmem:[%s2889_s5 + $0x8] sm:$0xff]  ;;  %v1587_v31 = vmov 3   ;;  %v1588_v32 = vmov 4   ;;  %v1589_v33 = vmov 5   ;;  %v1590_v34 = vmov 6   ;;  %s451_s19 = sld [smem:[#allocation2]] }
  0x5b   : > { %527 = vperm.xlu1 %1490, %v1734_v24   ;;  %517 = vperm.xlu0 %1489, %v1739_v25   ;;  %s1400_s20 = sld [smem:[#allocation2 + $0x80]]  ;;  %v2894_v35 = vmov 7   ;;  %v1781_v36 = vld [vmem:[%s1725_s11 + $0x20] sm:$0xff]  ;;  %v1784_v37 = vld [vmem:[%s1725_s11 + $0x28] sm:$0xff]  ;;  %v1810_v46 = vld [vmem:[%s1725_s11 + $0x30] sm:$0xff] }
  0x5c   : > { %s1401_s26 = sld [smem:[#allocation2 + $0x100]]  ;;  %v1791_v40 = vld [vmem:[%s1727_s12 + $0x20] sm:$0xff]  ;;  %v1794_v41 = vld [vmem:[%s1727_s12 + $0x28] sm:$0xff]  ;;  %v1813_v47 = vld [vmem:[%s1727_s12 + $0x30] sm:$0xff] }
  0x5d   : > { %v1797_v42 = vld [vmem:[%s1725_s11] sm:$0xff]  ;;  %v1800_v43 = vld [vmem:[%s1725_s11 + $0x8] sm:$0xff]  ;;  %s1825_s27 = sld [smem:[#allocation4]]  ;;  %v1848_v61 = vld [vmem:[%s1725_s11 + $0x38] sm:$0xff] }
  0x5e   : > { %2962 = vst [vmem:[#allocation11_spill] sm:$0xff] %v1797_v42  ;;  %2963 = vst [vmem:[#allocation12_spill] sm:$0xff] %v1800_v43  ;;  %v1803_v44 = vld [vmem:[%s1727_s12] sm:$0xff]  ;;  %v1807_v45 = vld [vmem:[%s1727_s12 + $0x8] sm:$0xff]  ;;  %s1885_s8 = sld [smem:[#allocation2 + $0x1]] }
  0x5f   : > { %532 = vperm.xlu1 %1490, %v1746_v27   ;;  %522 = vperm.xlu0 %1489, %v1751_v28   ;;  %2964 = vst [vmem:[#allocation13_spill] sm:$0xff] %v1803_v44  ;;  %2965 = vst [vmem:[#allocation14_spill] sm:$0xff] %v1807_v45  ;;  %v1828_v53 = vld [vmem:[%s1729_s7 + $0x20] sm:$0xff]  ;;  %v1831_v54 = vld [vmem:[%s1729_s7 + $0x28] sm:$0xff]  ;;  %s1898_s9 = sld [smem:[#allocation2 + $0x81]] }
  0x60   : > { %v1786_v38 = vstv %s451_s19  ;;  %v1838_v57 = vld [vmem:[%s1729_s7] sm:$0xff]  ;;  %v1841_v58 = vld [vmem:[%s1729_s7 + $0x8] sm:$0xff]  ;;  %v1856_v0 = vld [vmem:[%s1727_s12 + $0x38] sm:$0xff]  ;;  %s1404_s29 = sld [smem:[#allocation2 + $0x101]] }
  0x61   : > { %v1788_v39 = vstv %s1400_s20  ;;  %v457_v48 = vmul.f32 %v1786_v38, %v1781_v36  ;;  %v458_v49 = vmul.f32 %v1786_v38, %v1784_v37  ;;  %v453_v55 = vmul.f32 %v1786_v38, %v1797_v42  ;;  %v1859_v1 = vld [vmem:[%s1729_s7 + $0x30] sm:$0xff]  ;;  %v1883_v16 = vld [vmem:[%s1729_s7 + $0x38] sm:$0xff]  ;;  %s1913_s10 = sld [smem:[#allocation2 + $0x2]] }
  0x62   : > { %v467_v50 = vmul.f32 %v1788_v39, %v1791_v40  ;;  %v468_v51 = vmul.f32 %v1788_v39, %v1794_v41  ;;  %v1823_v52 = vstv %s1401_s26  ;;  %v463_v56 = vmul.f32 %v1788_v39, %v1803_v44  ;;  %v1873_v10 = vld [vmem:[%s1725_s11 + $0x10] sm:$0xff]  ;;  %v1889_v17 = vld [vmem:[%s1725_s11 + $0x18] sm:$0xff]  ;;  %s1920_s13 = sld [smem:[#allocation2 + $0x82]] }
  0x63   : > { %1492 = vset.pattern.permute.xlu1 %v1585_v29  ;;  %1491 = vset.pattern.permute.xlu0 %v1585_v29  ;;  %v454_v59 = vmul.f32 %v1786_v38, %v1800_v43  ;;  %v464_v60 = vmul.f32 %v1788_v39, %v1807_v45  ;;  %v459_v62 = vmul.f32 %v1786_v38, %v1810_v46  ;;  %v1876_v11 = vld [vmem:[%s1727_s12 + $0x10] sm:$0xff]  ;;  %v1892_v18 = vld [vmem:[%s1727_s12 + $0x18] sm:$0xff]  ;;  %v1902_v21 = vstv %s1825_s27  ;;  %s1952_s14 = sld [smem:[#allocation2 + $0x102]] }
  0x64   : > { %620 = vperm.xlu1 %1492, %v1751_v28   ;;  %616 = vperm.xlu0 %1491, %v1739_v25   ;;  %v469_v63 = vmul.f32 %v1788_v39, %v1813_v47  ;;  %v475_v2 = vadd.f32 %v467_v50, %v457_v48  ;;  %v476_v3 = vadd.f32 %v468_v51, %v458_v49  ;;  %v1916_v50 = vld [vmem:[%s1729_s7 + $0x18] sm:$0xff]  ;;  %s1963_s15 = sld [smem:[#allocation4 + $0x1]] }
  0x65   : > { %v485_v4 = vmul.f32 %v1823_v52, %v1828_v53  ;;  %v486_v5 = vmul.f32 %v1823_v52, %v1831_v54  ;;  %v471_v6 = vadd.f32 %v463_v56, %v453_v55  ;;  %v481_v7 = vmul.f32 %v1823_v52, %v1838_v57  ;;  %s2008_s16 = sld [smem:[#allocation4 + $0x2]] }
  0x66   : > { %v482_v8 = vmul.f32 %v1823_v52, %v1841_v58  ;;  %v460_v9 = vmul.f32 %v1786_v38, %v1848_v61  ;;  %v472_v12 = vadd.f32 %v464_v60, %v454_v59  ;;  %v470_v13 = vmul.f32 %v1788_v39, %v1856_v0  ;;  %s2037_s21 = sld [smem:[#allocation2 + $0x3]] }
  0x67   : > { %v477_v14 = vadd.f32 %v469_v63, %v459_v62  ;;  %v487_v15 = vmul.f32 %v1823_v52, %v1859_v1  ;;  %v455_v19 = vmul.f32 %v1786_v38, %v1873_v10  ;;  %v465_v20 = vmul.f32 %v1788_v39, %v1876_v11  ;;  %s2050_s30 = sld [smem:[#allocation2 + $0x83]] }
  0x68   : > { %624 = vperm.xlu1 %1492, %v1734_v24   ;;  %1493 = vset.pattern.permute.xlu0 %v1586_v30  ;;  %v493_v22 = vadd.f32 %v485_v4, %v475_v2  ;;  %v494_v23 = vadd.f32 %v486_v5, %v476_v3  ;;  %v489_v26 = vadd.f32 %v481_v7, %v471_v6  ;;  %v1942_v2 = vstv %s1885_s8  ;;  %s2069_s17 = sld [smem:[#allocation2 + $0x103]] }
  0x69   : > { %712 = vperm.xlu0 %1493, %v1739_v25   ;;  %v495_v48 = vadd.f32 %v487_v15, %v477_v14  ;;  %v456_v49 = vmul.f32 %v1786_v38, %v1889_v17  ;;  %v473_v51 = vadd.f32 %v465_v20, %v455_v19  ;;  %v1945_v4 = vstv %s1898_s9  ;;  %s2085_s18 = sld [smem:[#allocation2 + $0x4]] }
  0x6a   : > { %v1924_v56 = vadd.f32 %v1902_v21, %v493_v22  ;;  %v1927_v38 = vadd.f32 %v1902_v21, %v494_v23  ;;  %v556_v15 = vmul.f32 %v1942_v2, %v1889_v17  ;;  %v565_v19 = vmul.f32 %v1945_v4, %v1876_v11  ;;  %s2095_s19 = sld [smem:[#allocation2 + $0x84]] }
  0x6b   : > { %v1937_v62 = vadd.f32 %v1902_v21, %v495_v48  ;;  %v566_v20 = vmul.f32 %v1945_v4, %v1892_v18  ;;  %v564_v48 = vmul.f32 %v1945_v4, %v1807_v45  ;;  %v2017_v7 = vstv %s1952_s14  ;;  %s2117_s20 = sld [smem:[#allocation2 + $0x104]] }
  0x6c   : > { %1494 = vset.pattern.permute.xlu1 %v1586_v30  ;;  %2966 = vst [vmem:[#allocation15_spill] sm:$0xff] %v1924_v56  ;;  %2967 = vst [vmem:[#allocation16_spill] sm:$0xff] %v1927_v38  ;;  %s2126_s26 = sld [smem:[#allocation4 + $0x3]] }
  0x6d   : > { %716 = vperm.xlu1 %1494, %v1751_v28   ;;  %720 = vperm.xlu0 %1493, %v1734_v24   ;;  %2970 = vst [vmem:[#allocation19_spill] sm:$0xff] %v1937_v62  ;;  %v2024_v62 = vstv %s1963_s15  ;;  %s2182_s27 = sld [smem:[#allocation4 + $0x4]] }
  0x6e   : > { %s2201_s8 = sld [smem:[#allocation2 + $0x5]] }
  0x6f   : > { %s2215_s9 = sld [smem:[#allocation2 + $0x85]] }
  0x70   : > { %s2331_s14 = sld [smem:[#allocation2 + $0x86]] }
  0x71   : > { %1495 = vset.pattern.permute.xlu1 %v1585_v29  ;;  %1497 = vset.pattern.permute.xlu0 %v1587_v31  ;;  %v1905_v29 = vld [vmem:[%s1729_s7 + $0x10] sm:$0xff]  ;;  %s2354_s15 = sld [smem:[#allocation2 + $0x106]] }
  0x72   : > { %628 = vperm.xlu1 %1495, %v1746_v27   ;;  %812 = vperm.xlu0 %1497, %v1751_v28   ;;  %v483_v55 = vmul.f32 %v1823_v52, %v1905_v29 }
  0x74   : > { %v491_v3 = vadd.f32 %v483_v55, %v473_v51  ;;  %v567_v51 = vmul.f32 %v1945_v4, %v1791_v40  ;;  %v568_v55 = vmul.f32 %v1945_v4, %v1794_v41 }
  0x76   : > { %1496 = vset.pattern.permute.xlu1 %v1587_v31  ;;  %1500 = vset.pattern.permute.xlu0 %v1588_v32  ;;  %v1972_v22 = vadd.f32 %v1902_v21, %v491_v3 }
  0x77   : > { %808 = vperm.xlu1 %1496, %v1739_v25   ;;  %904 = vperm.xlu0 %1500, %v1739_v25  }
  0x78   : > { %2972 = vst [vmem:[#allocation21_spill] sm:$0xff] %v1972_v22 }
  0x7b   : > { %1498 = vset.pattern.permute.xlu1 %v1586_v30  ;;  %912 = vperm.xlu0 %1500, %v1734_v24   ;;  %v490_v30 = vadd.f32 %v482_v8, %v472_v12  ;;  %v1950_v8 = vstv %s1404_s29  ;;  %v574_v12 = vadd.f32 %v566_v20, %v556_v15  ;;  %s2241_s29 = sld [smem:[#allocation2 + $0x105]] }
  0x7c   : > { %724 = vperm.xlu1 %1498, %v1746_v27   ;;  %v583_v23 = vmul.f32 %v1950_v8, %v1905_v29  ;;  %v581_v6 = vmul.f32 %v1950_v8, %v1838_v57  ;;  %v585_v20 = vmul.f32 %v1950_v8, %v1828_v53 }
  0x7d   : > { %v1934_v59 = vadd.f32 %v1902_v21, %v490_v30  ;;  %v553_v30 = vmul.f32 %v1942_v2, %v1797_v42 }
  0x7f   : > { %1504 = vset.pattern.permute.xlu0 %v1589_v33  ;;  %2969 = vst [vmem:[#allocation18_spill] sm:$0xff] %v1934_v59 }
  0x80   : > { %1499 = vset.pattern.permute.xlu1 %v1587_v31  ;;  %1004 = vperm.xlu0 %1504, %v1751_v28  }
  0x81   : > { %816 = vperm.xlu1 %1499, %v1734_v24  }
  0x84   : > { %1507 = vset.pattern.permute.xlu0 %v1590_v34 }
  0x85   : > { %1501 = vset.pattern.permute.xlu1 %v1588_v32  ;;  %1096 = vperm.xlu0 %1507, %v1739_v25  }
  0x86   : > { %908 = vperm.xlu1 %1501, %v1751_v28  }
  0x89   : > { %1104 = vperm.xlu0 %1507, %v1734_v24  }
  0x8a   : > { %1502 = vset.pattern.permute.xlu1 %v1587_v31  ;;  %v478_v31 = vadd.f32 %v470_v13, %v460_v9  ;;  %v555_v13 = vmul.f32 %v1942_v2, %v1873_v10 }
  0x8b   : > { %820 = vperm.xlu1 %1502, %v1746_v27  }
  0x8d   : > { %1511 = vset.pattern.permute.xlu0 %v2894_v35 }
  0x8e   : > { %1196 = vperm.xlu0 %1511, %v1751_v28  }
  0x8f   : > { %1503 = vset.pattern.permute.xlu1 %v1589_v33 }
  0x90   : > { %1000 = vperm.xlu1 %1503, %v1739_v25  }
  0x92   : > { %1204 = vperm.xlu0 %1511, %v1746_v27  }
  0x94   : > { %1505 = vset.pattern.permute.xlu1 %v1588_v32  ;;  %v488_v32 = vmul.f32 %v1823_v52, %v1883_v16 }
  0x95   : > { %916 = vperm.xlu1 %1505, %v1746_v27  }
  0x96   : > { %v496_v60 = vadd.f32 %v488_v32, %v478_v31  ;;  %v554_v31 = vmul.f32 %v1942_v2, %v1800_v43  ;;  %v563_v32 = vmul.f32 %v1945_v4, %v1803_v44 }
  0x98   : > { %v1957_v9 = vadd.f32 %v1902_v21, %v496_v60  ;;  %v573_v60 = vadd.f32 %v565_v19, %v555_v13  ;;  %v571_v19 = vadd.f32 %v563_v32, %v553_v30  ;;  %v572_v5 = vadd.f32 %v564_v48, %v554_v31 }
  0x99   : > { %1506 = vset.pattern.permute.xlu1 %v1589_v33  ;;  %v677_v30 = vmul.f32 %v2017_v7, %v1838_v57  ;;  %v2973_v31 = vmov 7  }
  0x9a   : > { %1008 = vperm.xlu1 %1506, %v1734_v24   ;;  %2971 = vst [vmem:[#allocation20_spill] sm:$0xff] %v1957_v9  ;;  %v591_v38 = vadd.f32 %v583_v23, %v573_v60  ;;  %v682_v23 = vmul.f32 %v2017_v7, %v1831_v54  ;;  %v587_v9 = vmul.f32 %v1950_v8, %v1859_v1 }
  0x9e   : > { %1508 = vset.pattern.permute.xlu1 %v1590_v34 }
  0x9f   : > { %1100 = vperm.xlu1 %1508, %v1751_v28   ;;  %v466_v28 = vmul.f32 %v1788_v39, %v1892_v18  ;;  %v1930_v39 = vadd.f32 %v1902_v21, %v489_v26  ;;  %v1977_v26 = vstv %s1913_s10  ;;  %s2287_s10 = sld [smem:[#allocation4 + $0x5]] }
  0xa1   : > { %2968 = vst [vmem:[#allocation17_spill] sm:$0xff] %v1930_v39  ;;  %v474_v63 = vadd.f32 %v466_v28, %v456_v49  ;;  %v557_v49 = vmul.f32 %v1942_v2, %v1781_v36  ;;  %v558_v28 = vmul.f32 %v1942_v2, %v1784_v37 }
  0xa3   : > { %1509 = vset.pattern.permute.xlu1 %v1589_v33  ;;  %v484_v33 = vmul.f32 %v1823_v52, %v1916_v50  ;;  %v582_v52 = vmul.f32 %v1950_v8, %v1841_v58  ;;  %v576_v15 = vadd.f32 %v568_v55, %v558_v28  ;;  %v678_v28 = vmul.f32 %v2017_v7, %v1841_v58 }
  0xa4   : > { %1012 = vperm.xlu1 %1509, %v1746_v27   ;;  %v589_v55 = vadd.f32 %v581_v6, %v571_v19 }
  0xa5   : > { %v492_v14 = vadd.f32 %v484_v33, %v474_v63  ;;  %v584_v63 = vmul.f32 %v1950_v8, %v1916_v50  ;;  %v649_v33 = vmul.f32 %v1977_v26, %v1797_v42  ;;  %v590_v60 = vadd.f32 %v582_v52, %v572_v5 }
  0xa6   : > { %v2057_v52 = vstv %s2008_s16  ;;  %s2401_s16 = sld [smem:[#allocation4 + $0x6]] }
  0xa7   : > { %v2030_v32 = vadd.f32 %v1902_v21, %v492_v14  ;;  %v592_v48 = vadd.f32 %v584_v63, %v574_v12  ;;  %v651_v21 = vmul.f32 %v1977_v26, %v1873_v10  ;;  %v2044_v14 = vadd.f32 %v2024_v62, %v591_v38 }
  0xa8   : > { %1510 = vset.pattern.permute.xlu1 %v2894_v35  ;;  %v586_v35 = vmul.f32 %v1950_v8, %v1831_v54  ;;  %v652_v63 = vmul.f32 %v1977_v26, %v1889_v17  ;;  %v2060_v38 = vadd.f32 %v2024_v62, %v589_v55 }
  0xa9   : > { %1192 = vperm.xlu1 %1510, %v1739_v25   ;;  %v1980_v25 = vstv %s1920_s13  ;;  %2974 = vst [vmem:[#allocation22_spill] sm:$0xff] %v2030_v32  ;;  %2975 = vst [vmem:[#allocation23_spill] sm:$0xff] %v2044_v14  ;;  %v2054_v6 = vadd.f32 %v2024_v62, %v592_v48  ;;  %s2326_s13 = sld [smem:[#allocation2 + $0x6]] }
  0xaa   : > { %v659_v3 = vmul.f32 %v1980_v25, %v1803_v44  ;;  %v660_v13 = vmul.f32 %v1980_v25, %v1807_v45  ;;  %v661_v12 = vmul.f32 %v1980_v25, %v1876_v11  ;;  %v662_v5 = vmul.f32 %v1980_v25, %v1892_v18  ;;  %2977 = vst [vmem:[#allocation25_spill] sm:$0xff] %v2060_v38 }
  0xab   : > { %2976 = vst [vmem:[#allocation24_spill] sm:$0xff] %v2054_v6  ;;  %v663_v19 = vmul.f32 %v1980_v25, %v1791_v40 }
  0xac   : > { %v667_v56 = vadd.f32 %v659_v3, %v649_v33  ;;  %v594_v3 = vadd.f32 %v586_v35, %v576_v15 }
  0xad   : > { %1512 = vset.pattern.permute.xlu1 %v1590_v34  ;;  %v650_v34 = vmul.f32 %v1977_v26, %v1800_v43 }
  0xae   : > { %1108 = vperm.xlu1 %1512, %v1746_v27   ;;  %v575_v27 = vadd.f32 %v567_v51, %v557_v49  ;;  %v2075_v15 = vadd.f32 %v2024_v62, %v594_v3  ;;  %v664_v3 = vmul.f32 %v1980_v25, %v1794_v41 }
  0xaf   : > { %v668_v49 = vadd.f32 %v660_v13, %v650_v34  ;;  %v653_v13 = vmul.f32 %v1977_v26, %v1781_v36 }
  0xb0   : > { %v593_v33 = vadd.f32 %v585_v20, %v575_v27  ;;  %2980 = vst [vmem:[#allocation28_spill] sm:$0xff] %v2075_v15  ;;  %v669_v20 = vadd.f32 %v661_v12, %v651_v21 }
  0xb1   : > { %v686_v34 = vadd.f32 %v678_v28, %v668_v49  ;;  %v670_v49 = vadd.f32 %v662_v5, %v652_v63  ;;  %v680_v28 = vmul.f32 %v2017_v7, %v1916_v50  ;;  %v671_v12 = vadd.f32 %v663_v19, %v653_v13 }
  0xb2   : > { %1513 = vset.pattern.permute.xlu1 %v2973_v31  ;;  %v2072_v27 = vadd.f32 %v2024_v62, %v593_v33  ;;  %v654_v33 = vmul.f32 %v1977_v26, %v1784_v37  ;;  %v2101_v63 = vstv %s2037_s21  ;;  %v2110_v13 = vstv %s2050_s30  ;;  %s2435_s21 = sld [smem:[#allocation2 + $0x7]] }
  0xb3   : > { %1200 = vperm.xlu1 %1513, %v1734_v24   ;;  %v685_v24 = vadd.f32 %v677_v30, %v667_v56  ;;  %v2063_v56 = vadd.f32 %v2024_v62, %v590_v60  ;;  %v679_v30 = vmul.f32 %v2017_v7, %v1905_v29  ;;  %v2089_v60 = vadd.f32 %v2057_v52, %v686_v34  ;;  %s2441_s30 = sld [smem:[#allocation2 + $0x87]] }
  0xb4   : > { %2979 = vst [vmem:[#allocation27_spill] sm:$0xff] %v2072_v27  ;;  %v688_v35 = vadd.f32 %v680_v28, %v670_v49  ;;  %v672_v21 = vadd.f32 %v664_v3, %v654_v33  ;;  %v559_v5 = vmul.f32 %v1942_v2, %v1810_v46  ;;  %v569_v34 = vmul.f32 %v1945_v4, %v1813_v47 }
  0xb5   : > { %2978 = vst [vmem:[#allocation26_spill] sm:$0xff] %v2063_v56  ;;  %v2081_v48 = vadd.f32 %v2057_v52, %v685_v24  ;;  %2982 = vst [vmem:[#allocation30_spill] sm:$0xff] %v2089_v60  ;;  %v681_v24 = vmul.f32 %v2017_v7, %v1828_v53  ;;  %v687_v55 = vadd.f32 %v679_v30, %v669_v20  ;;  %v2124_v28 = vstv %s2069_s17  ;;  %s2467_s17 = sld [smem:[#allocation2 + $0x107]] }
  0xb6   : > { %v560_v30 = vmul.f32 %v1942_v2, %v1848_v61  ;;  %v570_v49 = vmul.f32 %v1945_v4, %v1856_v0  ;;  %v747_v33 = vmul.f32 %v2101_v63, %v1873_v10  ;;  %v748_v3 = vmul.f32 %v2101_v63, %v1889_v17 }
  0xb7   : > { %2981 = vst [vmem:[#allocation29_spill] sm:$0xff] %v2081_v48  ;;  %v689_v20 = vadd.f32 %v681_v24, %v671_v12  ;;  %v757_v12 = vmul.f32 %v2110_v13, %v1876_v11  ;;  %v758_v24 = vmul.f32 %v2110_v13, %v1892_v18  ;;  %v745_v2 = vmul.f32 %v2101_v63, %v1797_v42 }
  0xb8   : > { %v746_v4 = vmul.f32 %v2101_v63, %v1800_v43  ;;  %v755_v19 = vmul.f32 %v2110_v13, %v1803_v44  ;;  %v756_v31 = vmul.f32 %v2110_v13, %v1807_v45  ;;  %v577_v51 = vadd.f32 %v569_v34, %v559_v5 }
  0xb9   : > { %v2147_v60 = vstv %s2085_s18  ;;  %v2150_v48 = vstv %s2095_s19  ;;  %v578_v15 = vadd.f32 %v570_v49, %v560_v30  ;;  %v588_v27 = vmul.f32 %v1950_v8, %v1883_v16  ;;  %s2497_s18 = sld [smem:[#allocation4 + $0x7]] }
  0xba   : > { %v775_v6 = vmul.f32 %v2124_v28, %v1905_v29  ;;  %v776_v14 = vmul.f32 %v2124_v28, %v1916_v50  ;;  %v765_v32 = vadd.f32 %v757_v12, %v747_v33  ;;  %v766_v5 = vadd.f32 %v758_v24, %v748_v3 }
  0xbb   : > { %v773_v34 = vmul.f32 %v2124_v28, %v1838_v57  ;;  %v774_v22 = vmul.f32 %v2124_v28, %v1841_v58  ;;  %v763_v56 = vadd.f32 %v755_v19, %v745_v2  ;;  %v764_v30 = vadd.f32 %v756_v31, %v746_v4 }
  0xbc   : > { %v841_v8 = vmul.f32 %v2147_v60, %v1797_v42  ;;  %v851_v49 = vmul.f32 %v2150_v48, %v1803_v44  ;;  %v2167_v38 = vadd.f32 %v2057_v52, %v687_v55  ;;  %v2170_v33 = vstv %s2117_s20 }
  0xbd   : > { %v842_v3 = vmul.f32 %v2147_v60, %v1800_v43  ;;  %v852_v12 = vmul.f32 %v2150_v48, %v1807_v45  ;;  %v2177_v19 = vadd.f32 %v2057_v52, %v688_v35  ;;  %v690_v31 = vadd.f32 %v682_v23, %v672_v21 }
  0xbe   : > { %2983 = vst [vmem:[#allocation31_spill] sm:$0xff] %v2167_v38  ;;  %v2180_v24 = vadd.f32 %v2057_v52, %v689_v20  ;;  %v595_v2 = vadd.f32 %v587_v9, %v577_v51  ;;  %v596_v55 = vadd.f32 %v588_v27, %v578_v15  ;;  %v2185_v4 = vstv %s2126_s26 }
  0xbf   : > { %2984 = vst [vmem:[#allocation32_spill] sm:$0xff] %v2177_v19  ;;  %v783_v59 = vadd.f32 %v775_v6, %v765_v32  ;;  %v784_v39 = vadd.f32 %v776_v14, %v766_v5  ;;  %v781_v44 = vadd.f32 %v773_v34, %v763_v56  ;;  %v782_v43 = vadd.f32 %v774_v22, %v764_v30 }
  0xc0   : > { %2985 = vst [vmem:[#allocation33_spill] sm:$0xff] %v2180_v24  ;;  %v859_v42 = vadd.f32 %v851_v49, %v841_v8  ;;  %v869_v45 = vmul.f32 %v2170_v33, %v1838_v57  ;;  %v860_v35 = vadd.f32 %v852_v12, %v842_v3  ;;  %v870_v23 = vmul.f32 %v2170_v33, %v1841_v58 }
  0xc1   : > { %v655_v9 = vmul.f32 %v1977_v26, %v1810_v46  ;;  %v665_v51 = vmul.f32 %v1980_v25, %v1813_v47  ;;  %v2198_v22 = vadd.f32 %v2057_v52, %v690_v31  ;;  %v2204_v6 = vadd.f32 %v2024_v62, %v595_v2 }
  0xc2   : > { %v2207_v56 = vadd.f32 %v2024_v62, %v596_v55  ;;  %v2210_v15 = vadd.f32 %v2185_v4, %v783_v59  ;;  %v2213_v21 = vadd.f32 %v2185_v4, %v784_v39  ;;  %v2218_v20 = vadd.f32 %v2185_v4, %v781_v44 }
  0xc3   : > { %2986 = vst [vmem:[#allocation34_spill] sm:$0xff] %v2198_v22  ;;  %2987 = vst [vmem:[#allocation35_spill] sm:$0xff] %v2204_v6  ;;  %v2221_v5 = vadd.f32 %v2185_v4, %v782_v43  ;;  %v877_v34 = vadd.f32 %v869_v45, %v859_v42  ;;  %v656_v30 = vmul.f32 %v1977_v26, %v1848_v61  ;;  %v2231_v3 = vstv %s2182_s27 }
  0xc4   : > { %2988 = vst [vmem:[#allocation36_spill] sm:$0xff] %v2207_v56  ;;  %2989 = vst [vmem:[#allocation37_spill] sm:$0xff] %v2210_v15  ;;  %v878_v62 = vadd.f32 %v870_v23, %v860_v35  ;;  %v666_v59 = vmul.f32 %v1980_v25, %v1856_v0  ;;  %v673_v8 = vadd.f32 %v665_v51, %v655_v9 }
  0xc5   : > { %2990 = vst [vmem:[#allocation38_spill] sm:$0xff] %v2213_v21  ;;  %2991 = vst [vmem:[#allocation39_spill] sm:$0xff] %v2218_v20  ;;  %v683_v39 = vmul.f32 %v2017_v7, %v1859_v1  ;;  %v749_v43 = vmul.f32 %v2101_v63, %v1781_v36  ;;  %v759_v42 = vmul.f32 %v2110_v13, %v1791_v40 }
  0xc6   : > { %2992 = vst [vmem:[#allocation40_spill] sm:$0xff] %v2221_v5  ;;  %v684_v2 = vmul.f32 %v2017_v7, %v1883_v16  ;;  %v750_v55 = vmul.f32 %v2101_v63, %v1784_v37  ;;  %v2250_v35 = vadd.f32 %v2231_v3, %v877_v34  ;;  %v2253_v23 = vadd.f32 %v2231_v3, %v878_v62 }
  0xc7   : > { %v674_v9 = vadd.f32 %v666_v59, %v656_v30  ;;  %v691_v51 = vadd.f32 %v683_v39, %v673_v8  ;;  %v760_v45 = vmul.f32 %v2110_v13, %v1794_v41  ;;  %v767_v44 = vadd.f32 %v759_v42, %v749_v43 }
  0xc8   : > { %2993 = vst [vmem:[#allocation41_spill] sm:$0xff] %v2250_v35  ;;  %2994 = vst [vmem:[#allocation42_spill] sm:$0xff] %v2253_v23  ;;  %v777_v31 = vmul.f32 %v2124_v28, %v1828_v53  ;;  %v778_v7 = vmul.f32 %v2124_v28, %v1831_v54  ;;  %v845_v12 = vmul.f32 %v2147_v60, %v1781_v36  ;;  %v2266_v62 = vstv %s2201_s8 }
  0xc9   : > { %v846_v34 = vmul.f32 %v2147_v60, %v1784_v37  ;;  %v2269_v30 = vstv %s2215_s9  ;;  %v855_v59 = vmul.f32 %v2150_v48, %v1791_v40  ;;  %v856_v8 = vmul.f32 %v2150_v48, %v1794_v41 }
  0xca   : > { %v843_v39 = vmul.f32 %v2147_v60, %v1873_v10  ;;  %v853_v43 = vmul.f32 %v2150_v48, %v1876_v11  ;;  %v844_v49 = vmul.f32 %v2147_v60, %v1889_v17  ;;  %v854_v14 = vmul.f32 %v2150_v48, %v1892_v18 }
  0xcb   : > { %v692_v32 = vadd.f32 %v684_v2, %v674_v9  ;;  %v768_v27 = vadd.f32 %v760_v45, %v750_v55  ;;  %v939_v56 = vmul.f32 %v2266_v62, %v1873_v10  ;;  %v949_v6 = vmul.f32 %v2269_v30, %v1876_v11 }
  0xcc   : > { %v785_v5 = vadd.f32 %v777_v31, %v767_v44  ;;  %v873_v26 = vmul.f32 %v2170_v33, %v1828_v53  ;;  %v874_v25 = vmul.f32 %v2170_v33, %v1831_v54  ;;  %v2298_v23 = vstv %s2241_s29 }
  0xcd   : > { %v863_v35 = vadd.f32 %v855_v59, %v845_v12  ;;  %v864_v20 = vadd.f32 %v856_v8, %v846_v34  ;;  %v861_v21 = vadd.f32 %v853_v43, %v843_v39  ;;  %v871_v45 = vmul.f32 %v2170_v33, %v1905_v29 }
  0xce   : > { %v862_v55 = vadd.f32 %v854_v14, %v844_v49  ;;  %v872_v44 = vmul.f32 %v2170_v33, %v1916_v50  ;;  %v940_v31 = vmul.f32 %v2266_v62, %v1889_v17  ;;  %v950_v9 = vmul.f32 %v2269_v30, %v1892_v18 }
  0xcf   : > { %v957_v15 = vadd.f32 %v949_v6, %v939_v56  ;;  %v967_v12 = vmul.f32 %v2298_v23, %v1905_v29  ;;  %v751_v34 = vmul.f32 %v2101_v63, %v1810_v46  ;;  %v761_v14 = vmul.f32 %v2110_v13, %v1813_v47 }
  0xd0   : > { %v2317_v49 = vadd.f32 %v2057_v52, %v691_v51  ;;  %v2320_v59 = vadd.f32 %v2057_v52, %v692_v32  ;;  %v752_v8 = vmul.f32 %v2101_v63, %v1848_v61  ;;  %v762_v6 = vmul.f32 %v2110_v13, %v1856_v0 }
  0xd1   : > { %v786_v56 = vadd.f32 %v778_v7, %v768_v27  ;;  %v2329_v39 = vadd.f32 %v2185_v4, %v785_v5  ;;  %v881_v43 = vadd.f32 %v873_v26, %v863_v35  ;;  %v882_v22 = vadd.f32 %v874_v25, %v864_v20  ;;  %v2999_v26 = vld [vmem:[#allocation11_spill] sm:$0xff]  ;;  %v3000_v25 = vld [vmem:[#allocation13_spill] sm:$0xff] }
  0xd2   : > { %2996 = vst [vmem:[#allocation44_spill] sm:$0xff] %v2317_v49  ;;  %2997 = vst [vmem:[#allocation45_spill] sm:$0xff] %v2320_v59  ;;  %v879_v51 = vadd.f32 %v871_v45, %v861_v21  ;;  %v880_v24 = vadd.f32 %v872_v44, %v862_v55  ;;  %v2334_v52 = vstv %s2287_s10  ;;  %v968_v63 = vmul.f32 %v2298_v23, %v1916_v50  ;;  %v3001_v55 = vld [vmem:[#allocation12_spill] sm:$0xff]  ;;  %v3002_v44 = vld [vmem:[#allocation14_spill] sm:$0xff] }
  0xd3   : > { %2998 = vst [vmem:[#allocation46_spill] sm:$0xff] %v2329_v39  ;;  %v958_v13 = vadd.f32 %v950_v9, %v940_v31  ;;  %v975_v19 = vadd.f32 %v967_v12, %v957_v15  ;;  %v769_v38 = vadd.f32 %v761_v14, %v751_v34  ;;  %v779_v27 = vmul.f32 %v2124_v28, %v1859_v1 }
  0xd4   : > { %v770_v5 = vadd.f32 %v762_v6, %v752_v8  ;;  %v780_v20 = vmul.f32 %v2124_v28, %v1883_v16  ;;  %v937_v21 = vmul.f32 %v2266_v62, %v2999_v26  ;;  %v947_v35 = vmul.f32 %v2269_v30, %v3000_v25 }
  0xd5   : > { %v938_v15 = vmul.f32 %v2266_v62, %v3001_v55  ;;  %v948_v31 = vmul.f32 %v2269_v30, %v3002_v44  ;;  %v2357_v28 = vadd.f32 %v2185_v4, %v786_v56  ;;  %v2360_v9 = vadd.f32 %v2231_v3, %v881_v43 }
  0xd6   : > { %v2279_v42 = vpop.permute.xlu1 %527  ;;  %v2363_v12 = vadd.f32 %v2231_v3, %v882_v22  ;;  %v2366_v34 = vadd.f32 %v2231_v3, %v879_v51  ;;  %v2371_v8 = vadd.f32 %v2231_v3, %v880_v24  ;;  %v976_v6 = vadd.f32 %v968_v63, %v958_v13 }
  0xd7   : > { %3003 = vst [vmem:[#allocation11_spill] sm:$0xff] %v2357_v28  ;;  %3004 = vst [vmem:[#allocation13_spill] sm:$0xff] %v2360_v9  ;;  %v2374_v45 = vadd.f32 %v2334_v52, %v975_v19  ;;  %v787_v56 = vadd.f32 %v779_v27, %v769_v38  ;;  %v788_v43 = vadd.f32 %v780_v20, %v770_v5  ;;  %v2385_v24 = vstv %s2331_s14 }
  0xd8   : > { %3005 = vst [vmem:[#allocation12_spill] sm:$0xff] %v2363_v12  ;;  %3006 = vst [vmem:[#allocation14_spill] sm:$0xff] %v2366_v34  ;;  %v955_v59 = vadd.f32 %v947_v35, %v937_v21  ;;  %v965_v22 = vmul.f32 %v2298_v23, %v1838_v57  ;;  %v956_v49 = vadd.f32 %v948_v31, %v938_v15  ;;  %v2415_v27 = vstv %s2354_s15  ;;  %v2425_v12 = vpop.permute.xlu0 %517 }
  0xd9   : > { %3007 = vst [vmem:[#allocation47_spill] sm:$0xff] %v2371_v8  ;;  %3008 = vst [vmem:[#allocation48_spill] sm:$0xff] %v2374_v45  ;;  %v966_v51 = vmul.f32 %v2298_v23, %v1841_v58  ;;  %v2393_v5 = vadd.f32 %v2334_v52, %v976_v6  ;;  %v2397_v21 = vadd.f32 %v2185_v4, %v787_v56 }
  0xda   : > { %v2302_v2 = vpop.permute.xlu1 %532  ;;  %v1043_v38 = vmul.f32 %v2385_v24, %v3000_v25  ;;  %v1044_v6 = vmul.f32 %v2385_v24, %v3002_v44  ;;  %v2412_v20 = vadd.f32 %v2185_v4, %v788_v43  ;;  %v973_v56 = vadd.f32 %v965_v22, %v955_v59 }
  0xdb   : > { %2995 = vst [vmem:[#allocation43_spill] sm:$0xff] %v2302_v2  ;;  %v2382_v2 = vstv %s2326_s13  ;;  %3009 = vst [vmem:[#allocation49_spill] sm:$0xff] %v2397_v21  ;;  %v974_v19 = vadd.f32 %v966_v51, %v956_v49  ;;  %v847_v13 = vmul.f32 %v2147_v60, %v1810_v46  ;;  %v848_v63 = vmul.f32 %v2147_v60, %v1848_v61 }
  0xdc   : > { %v1033_v15 = vmul.f32 %v2382_v2, %v2999_v26  ;;  %v1034_v31 = vmul.f32 %v2382_v2, %v3001_v55  ;;  %3011 = vst [vmem:[#allocation51_spill] sm:$0xff] %v2412_v20  ;;  %v857_v7 = vmul.f32 %v2150_v48, %v1813_v47  ;;  %v858_v45 = vmul.f32 %v2150_v48, %v1856_v0 }
  0xdd   : > { %v941_v4 = vmul.f32 %v2266_v62, %v1781_v36  ;;  %v942_v49 = vmul.f32 %v2266_v62, %v1784_v37  ;;  %v951_v59 = vmul.f32 %v2269_v30, %v1791_v40  ;;  %v952_v60 = vmul.f32 %v2269_v30, %v1794_v41 }
  0xde   : > { %v1051_v43 = vadd.f32 %v1043_v38, %v1033_v15  ;;  %v1052_v22 = vadd.f32 %v1044_v6, %v1034_v31  ;;  %v1061_v48 = vmul.f32 %v2415_v27, %v1838_v57  ;;  %v1062_v51 = vmul.f32 %v2415_v27, %v1841_v58 }
  0xdf   : > { %v2338_v32 = vpop.permute.xlu1 %620  ;;  %v1037_v8 = vmul.f32 %v2382_v2, %v1781_v36  ;;  %v1038_v34 = vmul.f32 %v2382_v2, %v1784_v37  ;;  %v1047_v38 = vmul.f32 %v2385_v24, %v1791_v40  ;;  %v1048_v15 = vmul.f32 %v2385_v24, %v1794_v41 }
  0xe0   : > { %v865_v31 = vadd.f32 %v857_v7, %v847_v13  ;;  %v866_v6 = vadd.f32 %v858_v45, %v848_v63  ;;  %v875_v28 = vmul.f32 %v2170_v33, %v1859_v1  ;;  %v959_v39 = vadd.f32 %v951_v59, %v941_v4  ;;  %v2469_v63 = vpop.permute.xlu0 %522 }
  0xe1   : > { %v969_v36 = vmul.f32 %v2298_v23, %v1828_v53  ;;  %v970_v37 = vmul.f32 %v2298_v23, %v1831_v54  ;;  %v2465_v45 = vstv %s2401_s16  ;;  %v1056_v13 = vadd.f32 %v1048_v15, %v1038_v34 }
  0xe2   : > { %v1065_v4 = vmul.f32 %v2415_v27, %v1828_v53  ;;  %v1069_v7 = vadd.f32 %v1061_v48, %v1051_v43  ;;  %v1070_v41 = vadd.f32 %v1062_v51, %v1052_v22  ;;  %v883_v40 = vadd.f32 %v875_v28, %v865_v31 }
  0xe3   : > { %v2368_v14 = vpop.permute.xlu1 %624  ;;  %v2481_v20 = vadd.f32 %v2334_v52, %v974_v19  ;;  %v1035_v53 = vmul.f32 %v2382_v2, %v1873_v10  ;;  %v2488_v15 = vstv %s2435_s21  ;;  %v2491_v21 = vstv %s2441_s30 }
  0xe4   : > { %v1036_v28 = vmul.f32 %v2382_v2, %v1889_v17  ;;  %v2501_v19 = vadd.f32 %v2465_v45, %v1069_v7  ;;  %v2507_v22 = vadd.f32 %v2231_v3, %v883_v40  ;;  %v2509_v48 = vpop.permute.xlu0 %616  ;;  %v1063_v7 = vmul.f32 %v2415_v27, %v1905_v29 }
  0xe6   : > { %3013 = vst [vmem:[#allocation53_spill] sm:$0xff] %v2507_v22 }
  0xe8   : > { %v2399_v35 = vpop.permute.xlu1 %716 }
  0xe9   : > { %3010 = vst [vmem:[#allocation50_spill] sm:$0xff] %v2399_v35  ;;  %v960_v35 = vadd.f32 %v952_v60, %v942_v49  ;;  %v1066_v49 = vmul.f32 %v2415_v27, %v1831_v54  ;;  %v2478_v60 = vadd.f32 %v2334_v52, %v973_v56  ;;  %v1045_v54 = vmul.f32 %v2385_v24, %v1876_v11 }
  0xeb   : > { %v978_v34 = vadd.f32 %v970_v37, %v960_v35  ;;  %v1074_v43 = vadd.f32 %v1066_v49, %v1056_v13  ;;  %v2504_v35 = vadd.f32 %v2465_v45, %v1070_v41  ;;  %v1141_v37 = vmul.f32 %v2491_v21, %v1876_v11  ;;  %v2554_v11 = vpop.permute.xlu0 %712 }
  0xec   : > { %v1053_v40 = vadd.f32 %v1045_v54, %v1035_v53  ;;  %v944_v49 = vmul.f32 %v2266_v62, %v1848_v61 }
  0xed   : > { %v2443_v9 = vpop.permute.xlu1 %628  ;;  %v2524_v41 = vadd.f32 %v2334_v52, %v978_v34  ;;  %v2535_v13 = vadd.f32 %v2465_v45, %v1074_v43  ;;  %v1146_v34 = vmul.f32 %v2491_v21, %v1856_v0 }
  0xee   : > { %3012 = vst [vmem:[#allocation52_spill] sm:$0xff] %v2443_v9  ;;  %v876_v9 = vmul.f32 %v2170_v33, %v1883_v16  ;;  %v1055_v33 = vadd.f32 %v1047_v38, %v1037_v8  ;;  %v977_v38 = vadd.f32 %v969_v36, %v959_v39  ;;  %v1046_v39 = vmul.f32 %v2385_v24, %v1892_v18 }
  0xef   : > { %v1131_v36 = vmul.f32 %v2488_v15, %v1873_v10  ;;  %3015 = vst [vmem:[#allocation55_spill] sm:$0xff] %v2524_v41  ;;  %v1064_v10 = vmul.f32 %v2415_v27, %v1916_v50 }
  0xf0   : > { %v884_v8 = vadd.f32 %v876_v9, %v866_v6  ;;  %v1073_v56 = vadd.f32 %v1065_v4, %v1055_v33  ;;  %v2517_v6 = vadd.f32 %v2334_v52, %v977_v38  ;;  %v2529_v33 = vstv %s2467_s17 }
  0xf1   : > { %v1054_v4 = vadd.f32 %v1046_v39, %v1036_v28  ;;  %v1142_v38 = vmul.f32 %v2491_v21, %v1892_v18  ;;  %v1149_v54 = vadd.f32 %v1141_v37, %v1131_v36  ;;  %v2559_v36 = vstv %s2497_s18  ;;  %v2599_v18 = vpop.permute.xlu0 %720 }
  0xf2   : > { %v2475_v59 = vpop.permute.xlu1 %808  ;;  %v2514_v31 = vadd.f32 %v2231_v3, %v884_v8  ;;  %v2532_v3 = vadd.f32 %v2465_v45, %v1073_v56  ;;  %v1132_v8 = vmul.f32 %v2488_v15, %v1889_v17  ;;  %v1159_v56 = vmul.f32 %v2529_v33, %v1905_v29 }
  0xf3   : > { %v1071_v17 = vadd.f32 %v1063_v7, %v1053_v40  ;;  %v1072_v53 = vadd.f32 %v1064_v10, %v1054_v4  ;;  %v1160_v29 = vmul.f32 %v2529_v33, %v1916_v50  ;;  %v943_v28 = vmul.f32 %v2266_v62, %v1810_v46 }
  0xf4   : > { %3014 = vst [vmem:[#allocation54_spill] sm:$0xff] %v2514_v31  ;;  %v1150_v37 = vadd.f32 %v1142_v38, %v1132_v8  ;;  %v1167_v40 = vadd.f32 %v1159_v56, %v1149_v54  ;;  %v953_v7 = vmul.f32 %v2269_v30, %v1813_v47  ;;  %v954_v39 = vmul.f32 %v2269_v30, %v1856_v0 }
  0xf5   : > { %v971_v4 = vmul.f32 %v2298_v23, %v1859_v1  ;;  %v1129_v10 = vmul.f32 %v2488_v15, %v2999_v26  ;;  %v1130_v50 = vmul.f32 %v2488_v15, %v3001_v55  ;;  %v1139_v8 = vmul.f32 %v2491_v21, %v3000_v25 }
  0xf6   : > { %v1140_v62 = vmul.f32 %v2491_v21, %v3002_v44  ;;  %v1039_v30 = vmul.f32 %v2382_v2, %v1810_v46  ;;  %v1040_v54 = vmul.f32 %v2382_v2, %v1848_v61  ;;  %v1049_v26 = vmul.f32 %v2385_v24, %v1813_v47 }
  0xf7   : > { %v2511_v51 = vpop.permute.xlu1 %724  ;;  %v1050_v55 = vmul.f32 %v2385_v24, %v1856_v0  ;;  %v1135_v25 = vmul.f32 %v2488_v15, %v1810_v46  ;;  %v1136_v44 = vmul.f32 %v2488_v15, %v1848_v61  ;;  %v1145_v56 = vmul.f32 %v2491_v21, %v1813_v47 }
  0xf8   : > { %v1168_v2 = vadd.f32 %v1160_v29, %v1150_v37  ;;  %v961_v9 = vadd.f32 %v953_v7, %v943_v28  ;;  %v962_v31 = vadd.f32 %v954_v39, %v944_v49  ;;  %v972_v24 = vmul.f32 %v2298_v23, %v1883_v16 }
  0xf9   : > { %v1147_v22 = vadd.f32 %v1139_v8, %v1129_v10  ;;  %v1148_v41 = vadd.f32 %v1140_v62, %v1130_v50  ;;  %v1157_v46 = vmul.f32 %v2529_v33, %v1838_v57  ;;  %v1158_v47 = vmul.f32 %v2529_v33, %v1841_v58  ;;  %v1515_v62 = vld [vmem:[%s1725_s11 + $0x28] sm:$0xff] }
  0xfa   : > { %v1057_v61 = vadd.f32 %v1049_v26, %v1039_v30  ;;  %v1058_v0 = vadd.f32 %v1050_v55, %v1040_v54  ;;  %v1067_v28 = vmul.f32 %v2415_v27, %v1859_v1  ;;  %v1068_v49 = vmul.f32 %v2415_v27, %v1883_v16  ;;  %v1514_v27 = vld [vmem:[%s1725_s11 + $0x20] sm:$0xff]  ;;  %v1517_v54 = vld [vmem:[%s1727_s12 + $0x28] sm:$0xff]  ;;  %v2631_v26 = vpop.permute.xlu0 %812  ;;  %s1399_s11 = sshll.u32 %s1378_s24, 1 }
  0xfb   : > { %v1153_v39 = vadd.f32 %v1145_v56, %v1135_v25  ;;  %v1154_v37 = vadd.f32 %v1146_v34, %v1136_v44  ;;  %v1163_v57 = vmul.f32 %v2529_v33, %v1859_v1  ;;  %v1164_v58 = vmul.f32 %v2529_v33, %v1883_v16  ;;  %v1516_v30 = vld [vmem:[%s1727_s12 + $0x20] sm:$0xff]  ;;  %p419_p11 = scmp.lt.s32.totalorder %s1399_s11, 5 }
  0xfc   : > { %v2549_v43 = vpop.permute.xlu1 %816  ;;  %v2618_v29 = vadd.f32 %v2465_v45, %v1071_v17  ;;  %v2621_v7 = vadd.f32 %v2465_v45, %v1072_v53  ;;  %v979_v10 = vadd.f32 %v971_v4, %v961_v9  ;;  %v980_v50 = vadd.f32 %v972_v24, %v962_v31 }
  0xfd   : > { %v1133_v8 = vmul.f32 %v1514_v27, %v2488_v15  ;;  %v1134_v34 = vmul.f32 %v1515_v62, %v2488_v15  ;;  %v1143_v1 = vmul.f32 %v1516_v30, %v2491_v21  ;;  %v1144_v16 = vmul.f32 %v1517_v54, %v2491_v21  ;;  %v3038_v30 = vld [vmem:[#allocation24_spill] sm:$0xff]  ;;  %s3138_s11 = smov (!%p419_p11, %s1399_s11), 5 }
  0xfe   : > { %v1165_v17 = vadd.f32 %v1157_v46, %v1147_v22  ;;  %v1166_v53 = vadd.f32 %v1158_v47, %v1148_v41  ;;  %v1075_v9 = vadd.f32 %v1067_v28, %v1057_v61  ;;  %v1076_v31 = vadd.f32 %v1068_v49, %v1058_v0  ;;  %v1518_v46 = vld [vmem:[%s1729_s7 + $0x20] sm:$0xff]  ;;  %v1519_v47 = vld [vmem:[%s1729_s7 + $0x28] sm:$0xff]  ;;  %v2653_v0 = vpop.permute.xlu0 %904  ;;  %s421_s23 = scalar_lea.vmem %s2890_s6, %s3138_s11 }
  0xff   : > { %v2634_v4 = vadd.f32 %v2559_v36, %v1167_v40  ;;  %v2637_v55 = vadd.f32 %v2559_v36, %v1168_v2  ;;  %v1171_v15 = vadd.f32 %v1163_v57, %v1153_v39  ;;  %v1172_v25 = vadd.f32 %v1164_v58, %v1154_v37  ;;  %v3054_v57 = vld [vmem:[#allocation31_spill] sm:$0xff]  ;;  %v3057_v37 = vld [vmem:[#allocation32_spill] sm:$0xff] }
 0x100   : > { %v2644_v22 = vadd.f32 %v2334_v52, %v979_v10  ;;  %v2647_v41 = vadd.f32 %v2334_v52, %v980_v50  ;;  %v1151_v24 = vadd.f32 %v1143_v1, %v1133_v8  ;;  %v1152_v40 = vadd.f32 %v1144_v16, %v1134_v34  ;;  %v3020_v10 = vld [vmem:[#allocation17_spill] sm:$0xff]  ;;  %v3022_v8 = vld [vmem:[#allocation18_spill] sm:$0xff] }
 0x101   : > { %v2581_v38 = vpop.permute.xlu1 %908  ;;  %v1161_v2 = vmul.f32 %v1518_v46, %v2529_v33  ;;  %v1162_v61 = vmul.f32 %v1519_v47, %v2529_v33  ;;  %v2656_v28 = vadd.f32 %v2559_v36, %v1165_v17  ;;  %v2659_v49 = vadd.f32 %v2559_v36, %v1166_v53  ;;  %v3024_v1 = vld [vmem:[#allocation25_spill] sm:$0xff]  ;;  %v3026_v17 = vld [vmem:[#allocation26_spill] sm:$0xff] }
 0x102   : > { %v2662_v39 = vadd.f32 %v2465_v45, %v1075_v9  ;;  %v2665_v52 = vadd.f32 %v2465_v45, %v1076_v31  ;;  %v2670_v33 = vadd.f32 %v2559_v36, %v1171_v15  ;;  %v2673_v58 = vadd.f32 %v2559_v36, %v1172_v25  ;;  %v2691_v46 = vpop.permute.xlu0 %912  ;;  %v3034_v47 = vld [vmem:[#allocation22_spill] sm:$0xff]  ;;  %v3045_v45 = vld [vmem:[#allocation29_spill] sm:$0xff] }
 0x103   : > { %v3021_v50 = vmax.f32 %v3020_v10, 0.0  ;;  %v3023_v62 = vmax.f32 %v3022_v8, 0.0  ;;  %v3025_v54 = vmax.f32 %v3024_v1, 0.0  ;;  %v3027_v53 = vmax.f32 %v3026_v17, 0.0  ;;  %v3028_v8 = vld [vmem:[#allocation15_spill] sm:$0xff] }
 0x104   : > { %3016 = vst [vmem:[#allocation56_spill] sm:$0xff] %v2662_v39  ;;  %3017 = vst [vmem:[#allocation57_spill] sm:$0xff] %v2665_v52  ;;  %v1169_v15 = vadd.f32 %v1161_v2, %v1151_v24  ;;  %v1170_v25 = vadd.f32 %v1162_v61, %v1152_v40  ;;  %v3032_v2 = vld [vmem:[#allocation21_spill] sm:$0xff]  ;;  %v3035_v10 = vmax.f32 %v3034_v47, 0.0 }
 0x105   : > { %3018 = vst [vmem:[#allocation58_spill] sm:$0xff] %v2670_v33  ;;  %3019 = vst [vmem:[#allocation59_spill] sm:$0xff] %v2673_v58  ;;  %v535_v27 = vmul.f32 %v2425_v12, %v3021_v50  ;;  %v536_v34 = vmul.f32 %v2425_v12, %v3023_v62  ;;  %v631_v16 = vmul.f32 %v2509_v48, %v3025_v54  ;;  %v3029_v62 = vmax.f32 %v3028_v8, 0.0  ;;  %v3030_v54 = vld [vmem:[#allocation16_spill] sm:$0xff]  ;;  %v3036_v12 = vld [vmem:[#allocation23_spill] sm:$0xff] }
 0x106   : > { %v2611_v23 = vpop.permute.xlu1 %820  ;;  %v632_v9 = vmul.f32 %v2509_v48, %v3027_v53  ;;  %v3031_v48 = vmax.f32 %v3030_v54, 0.0  ;;  %v3033_v61 = vmax.f32 %v3032_v2, 0.0  ;;  %v538_v50 = vmul.f32 %v2469_v63, %v3035_v10  ;;  %v3043_v10 = vld [vmem:[#allocation28_spill] sm:$0xff]  ;;  %v3061_v58 = vld [vmem:[#allocation34_spill] sm:$0xff]  ;;  %v1005_v33 = vpop.permute.xlu0 %1004 }
 0x107   : > { %v539_v1 = vmul.f32 %v2279_v42, %v3029_v62  ;;  %v3037_v8 = vmax.f32 %v3036_v12, 0.0  ;;  %v3039_v54 = vmax.f32 %v3038_v30, 0.0  ;;  %v2718_v40 = vadd.f32 %v2559_v36, %v1169_v15 }
 0x108   : > { %v540_v17 = vmul.f32 %v2279_v42, %v3031_v48  ;;  %v537_v53 = vmul.f32 %v2469_v63, %v3033_v61  ;;  %v639_v48 = vadd.f32 %v631_v16, %v535_v27  ;;  %v640_v24 = vadd.f32 %v632_v9, %v536_v34  ;;  %v3041_v61 = vld [vmem:[#allocation27_spill] sm:$0xff]  ;;  %v3047_v27 = vld [vmem:[#allocation30_spill] sm:$0xff] }
 0x109   : > { %v633_v62 = vmul.f32 %v2338_v32, %v3037_v8  ;;  %v634_v42 = vmul.f32 %v2338_v32, %v3039_v54  ;;  %3040 = vst [vmem:[#allocation17_spill] sm:$0xff] %v2718_v40  ;;  %v2721_v2 = vadd.f32 %v2559_v36, %v1170_v25  ;;  %v3042_v47 = vmax.f32 %v3041_v61, 0.0  ;;  %v3049_v36 = vld [vmem:[#allocation19_spill] sm:$0xff]  ;;  %v3052_v61 = vld [vmem:[#allocation20_spill] sm:$0xff] }
 0x10a   : > { %v3044_v12 = vmax.f32 %v3043_v10, 0.0  ;;  %v3046_v30 = vmax.f32 %v3045_v45, 0.0  ;;  %v3048_v34 = vmax.f32 %v3047_v27, 0.0  ;;  %v3050_v15 = vmax.f32 %v3049_v36, 0.0  ;;  %v3051_v25 = vld [vmem:[#allocation43_spill] sm:$0xff] }
 0x10b   : > { %v2639_v44 = vpop.permute.xlu1 %1000  ;;  %v635_v63 = vmul.f32 %v2368_v14, %v3042_v47  ;;  %v3053_v47 = vmax.f32 %v3052_v61, 0.0  ;;  %v641_v56 = vadd.f32 %v633_v62, %v537_v53  ;;  %v3071_v53 = vld [vmem:[#allocation46_spill] sm:$0xff] }
 0x10c   : > { %v636_v8 = vmul.f32 %v2368_v14, %v3044_v12  ;;  %v727_v32 = vmul.f32 %v2554_v11, %v3046_v30  ;;  %v728_v16 = vmul.f32 %v2554_v11, %v3048_v34  ;;  %v541_v54 = vmul.f32 %v3051_v25, %v3050_v15  ;;  %v3056_v12 = vld [vmem:[#allocation50_spill] sm:$0xff]  ;;  %v3059_v34 = vld [vmem:[#allocation33_spill] sm:$0xff] }
 0x10d   : > { %v542_v10 = vmul.f32 %v3051_v25, %v3053_v47  ;;  %v3055_v14 = vmax.f32 %v3054_v57, 0.0  ;;  %v3058_v30 = vmax.f32 %v3057_v37, 0.0  ;;  %v642_v11 = vadd.f32 %v634_v42, %v538_v50  ;;  %v3063_v25 = vld [vmem:[#allocation37_spill] sm:$0xff] }
 0x10e   : > { %v3060_v21 = vmax.f32 %v3059_v34, 0.0  ;;  %v3062_v15 = vmax.f32 %v3061_v58, 0.0  ;;  %v3064_v47 = vmax.f32 %v3063_v25, 0.0  ;;  %v1188_v50 = vmax.f32 %v2721_v2, 0.0  ;;  %v3069_v25 = vld [vmem:[#allocation40_spill] sm:$0xff] }
 0x10f   : > { %v729_v45 = vmul.f32 %v3056_v12, %v3055_v14  ;;  %v730_v27 = vmul.f32 %v3056_v12, %v3058_v30  ;;  %v3065_v14 = vld [vmem:[#allocation38_spill] sm:$0xff]  ;;  %v643_v62 = vadd.f32 %v635_v63, %v539_v1  ;;  %v644_v42 = vadd.f32 %v636_v8, %v540_v17  ;;  %v3073_v17 = vld [vmem:[#allocation11_spill] sm:$0xff] }
 0x110   : > { %v2689_v31 = vpop.permute.xlu1 %916  ;;  %v731_v36 = vmul.f32 %v2599_v18, %v3060_v21  ;;  %v732_v61 = vmul.f32 %v2599_v18, %v3062_v15  ;;  %v825_v57 = vmul.f32 %v2631_v26, %v3064_v47  ;;  %v3066_v52 = vmax.f32 %v3065_v14, 0.0  ;;  %v3067_v18 = vld [vmem:[#allocation39_spill] sm:$0xff] }
 0x111   : > { %v735_v21 = vadd.f32 %v727_v32, %v639_v48  ;;  %v736_v12 = vadd.f32 %v728_v16, %v640_v24  ;;  %v737_v58 = vadd.f32 %v729_v45, %v641_v56  ;;  %v738_v30 = vadd.f32 %v730_v27, %v642_v11  ;;  %v1097_v24 = vpop.permute.xlu0 %1096  ;;  %v3075_v63 = vld [vmem:[#allocation35_spill] sm:$0xff]  ;;  %v3077_v32 = vld [vmem:[#allocation52_spill] sm:$0xff] }
 0x112   : > { %v826_v37 = vmul.f32 %v2631_v26, %v3066_v52  ;;  %v3068_v34 = vmax.f32 %v3067_v18, 0.0  ;;  %v3070_v47 = vmax.f32 %v3069_v25, 0.0  ;;  %v739_v26 = vadd.f32 %v731_v36, %v643_v62  ;;  %v3078_v45 = vld [vmem:[#allocation36_spill] sm:$0xff] }
 0x113   : > { %v740_v52 = vadd.f32 %v732_v61, %v644_v42  ;;  %v3072_v40 = vmax.f32 %v3071_v53, 0.0  ;;  %v3074_v48 = vmax.f32 %v3073_v17, 0.0  ;;  %v3076_v8 = vmax.f32 %v3075_v63, 0.0  ;;  %v3080_v61 = vld [vmem:[#allocation41_spill] sm:$0xff] }
 0x114   : > { %v823_v15 = vmul.f32 %v2475_v59, %v3068_v34  ;;  %v824_v14 = vmul.f32 %v2475_v59, %v3070_v47  ;;  %v3079_v27 = vmax.f32 %v3078_v45, 0.0  ;;  %v833_v11 = vadd.f32 %v825_v57, %v737_v58  ;;  %v3086_v47 = vld [vmem:[#allocation47_spill] sm:$0xff]  ;;  %v3088_v57 = vld [vmem:[#allocation44_spill] sm:$0xff] }
 0x115   : > { %v2735_v9 = vpop.permute.xlu1 %1008  ;;  %v827_v1 = vmul.f32 %v2549_v43, %v3072_v40  ;;  %v828_v56 = vmul.f32 %v2549_v43, %v3074_v48  ;;  %v637_v16 = vmul.f32 %v3077_v32, %v3076_v8  ;;  %v834_v36 = vadd.f32 %v826_v37, %v738_v30  ;;  %v3082_v40 = vld [vmem:[#allocation42_spill] sm:$0xff]  ;;  %v3090_v30 = vld [vmem:[#allocation45_spill] sm:$0xff] }
 0x116   : > { %v638_v59 = vmul.f32 %v3077_v32, %v3079_v27  ;;  %v3081_v62 = vmax.f32 %v3080_v61, 0.0  ;;  %v3083_v42 = vmax.f32 %v3082_v40, 0.0  ;;  %v3084_v43 = vld [vmem:[#allocation14_spill] sm:$0xff]  ;;  %v3087_v17 = vmax.f32 %v3086_v47, 0.0  ;;  %v3092_v61 = vld [vmem:[#allocation13_spill] sm:$0xff] }
 0x117   : > { %v3085_v34 = vmax.f32 %v3084_v43, 0.0  ;;  %v831_v63 = vadd.f32 %v823_v15, %v735_v21  ;;  %v832_v8 = vadd.f32 %v824_v14, %v736_v12  ;;  %v3089_v37 = vmax.f32 %v3088_v57, 0.0  ;;  %v1105_v21 = vpop.permute.xlu0 %1104 }
 0x118   : > { %v919_v53 = vmul.f32 %v2653_v0, %v3081_v62  ;;  %v920_v18 = vmul.f32 %v2653_v0, %v3083_v42  ;;  %v922_v48 = vmul.f32 %v2581_v38, %v3087_v17  ;;  %v3091_v32 = vmax.f32 %v3090_v30, 0.0  ;;  %v3094_v42 = vld [vmem:[#allocation12_spill] sm:$0xff] }
 0x119   : > { %v921_v25 = vmul.f32 %v2581_v38, %v3085_v34  ;;  %v733_v58 = vmul.f32 %v2511_v51, %v3089_v37  ;;  %v835_v27 = vadd.f32 %v827_v1, %v739_v26  ;;  %v836_v0 = vadd.f32 %v828_v56, %v740_v52  ;;  %v3098_v56 = vld [vmem:[#allocation48_spill] sm:$0xff] }
 0x11a   : > { %v1101_v39 = vpop.permute.xlu1 %1100  ;;  %v734_v45 = vmul.f32 %v2511_v51, %v3091_v32  ;;  %v3093_v62 = vmax.f32 %v3092_v61, 0.0  ;;  %v3095_v43 = vmax.f32 %v3094_v42, 0.0  ;;  %v645_v15 = vadd.f32 %v637_v16, %v541_v54 }
 0x11b   : > { %v646_v14 = vadd.f32 %v638_v59, %v542_v10  ;;  %v3096_v34 = vmax.f32 %v2478_v60, 0.0  ;;  %v3097_v51 = vmax.f32 %v2481_v20, 0.0  ;;  %v929_v52 = vadd.f32 %v921_v25, %v833_v11  ;;  %v3101_v59 = vld [vmem:[#allocation49_spill] sm:$0xff] }
 0x11c   : > { %v923_v40 = vmul.f32 %v2691_v46, %v3093_v62  ;;  %v924_v38 = vmul.f32 %v2691_v46, %v3095_v43  ;;  %v930_v1 = vadd.f32 %v922_v48, %v834_v36  ;;  %v3099_v17 = vmax.f32 %v3098_v56, 0.0  ;;  %v3103_v62 = vld [vmem:[#allocation51_spill] sm:$0xff] }
 0x11d   : > { %v1015_v47 = vmul.f32 %v2639_v44, %v3096_v34  ;;  %v1016_v26 = vmul.f32 %v2639_v44, %v3097_v51  ;;  %v3100_v37 = vmax.f32 %v2393_v5, 0.0  ;;  %v927_v30 = vadd.f32 %v919_v53, %v831_v63  ;;  %v3110_v43 = vld [vmem:[#allocation55_spill] sm:$0xff]  ;;  %v3116_v51 = vld [vmem:[#allocation54_spill] sm:$0xff] }
 0x11e   : > { %v1017_v57 = vmul.f32 %v1005_v33, %v3099_v17  ;;  %v928_v32 = vadd.f32 %v920_v18, %v832_v8  ;;  %v741_v54 = vadd.f32 %v733_v58, %v645_v15  ;;  %v742_v10 = vadd.f32 %v734_v45, %v646_v14 }
 0x11f   : > { %v1013_v12 = vpop.permute.xlu1 %1012  ;;  %v1018_v46 = vmul.f32 %v1005_v33, %v3100_v37  ;;  %v931_v16 = vadd.f32 %v923_v40, %v835_v27  ;;  %v932_v60 = vadd.f32 %v924_v38, %v836_v0  ;;  %v3102_v61 = vmax.f32 %v3101_v59, 0.0  ;;  %v1197_v40 = vpop.permute.xlu0 %1196 }
 0x120   : > { %v3104_v44 = vmax.f32 %v3103_v62, 0.0  ;;  %v1023_v36 = vadd.f32 %v1015_v47, %v927_v30  ;;  %v1024_v25 = vadd.f32 %v1016_v26, %v928_v32  ;;  %v3105_v48 = vmax.f32 %v2501_v19, 0.0  ;;  %v3114_v47 = vld [vmem:[#allocation53_spill] sm:$0xff] }
 0x121   : > { %v829_v20 = vmul.f32 %v2611_v23, %v3102_v61  ;;  %v3106_v33 = vmax.f32 %v2504_v35, 0.0  ;;  %v1025_v63 = vadd.f32 %v1017_v57, %v929_v52  ;;  %v1026_v8 = vadd.f32 %v1018_v46, %v930_v1 }
 0x122   : > { %v830_v11 = vmul.f32 %v2611_v23, %v3104_v44  ;;  %v1111_v5 = vmul.f32 %v1097_v24, %v3105_v48  ;;  %v3107_v58 = vmax.f32 %v2532_v3, 0.0  ;;  %v3108_v27 = vmax.f32 %v2535_v13, 0.0  ;;  %v3124_v44 = vld [vmem:[#allocation56_spill] sm:$0xff] }
 0x123   : > { %v1112_v53 = vmul.f32 %v1097_v24, %v3106_v33  ;;  %v3109_v23 = vmax.f32 %v2517_v6, 0.0  ;;  %v3111_v19 = vmax.f32 %v3110_v43, 0.0  ;;  %v3112_v35 = vmax.f32 %v2618_v29, 0.0  ;;  %v3132_v43 = vld [vmem:[#allocation17_spill] sm:$0xff] }
 0x124   : > { %v1193_v18 = vpop.permute.xlu1 %1192  ;;  %v1115_v45 = vmul.f32 %v1105_v21, %v3107_v58  ;;  %v1116_v0 = vmul.f32 %v1105_v21, %v3108_v27  ;;  %v3113_v15 = vmax.f32 %v2621_v7, 0.0  ;;  %v837_v3 = vadd.f32 %v829_v20, %v741_v54 }
 0x125   : > { %v1019_v42 = vmul.f32 %v2735_v9, %v3109_v23  ;;  %v1020_v38 = vmul.f32 %v2735_v9, %v3111_v19  ;;  %v1113_v24 = vmul.f32 %v1101_v39, %v3112_v35  ;;  %v838_v34 = vadd.f32 %v830_v11, %v742_v10  ;;  %v1205_v10 = vpop.permute.xlu0 %1204 }
 0x126   : > { %v1114_v14 = vmul.f32 %v1101_v39, %v3113_v15  ;;  %v3115_v13 = vmax.f32 %v3114_v47, 0.0  ;;  %v3117_v6 = vmax.f32 %v3116_v51, 0.0  ;;  %v1119_v52 = vadd.f32 %v1111_v5, %v1023_v36  ;;  %v3126_v36 = vld [vmem:[#allocation57_spill] sm:$0xff]  ;;  %v3130_v5 = vld [vmem:[#allocation59_spill] sm:$0xff] }
 0x127   : > { %v1120_v1 = vadd.f32 %v1112_v53, %v1024_v25  ;;  %v3118_v9 = vmax.f32 %v2634_v4, 0.0  ;;  %v3119_v29 = vmax.f32 %v2637_v55, 0.0  ;;  %v3120_v7 = vmax.f32 %v2644_v22, 0.0  ;;  %v3128_v25 = vld [vmem:[#allocation58_spill] sm:$0xff] }
 0x128   : > { %v925_v21 = vmul.f32 %v2689_v31, %v3115_v13  ;;  %v926_v26 = vmul.f32 %v2689_v31, %v3117_v6  ;;  %v3121_v57 = vmax.f32 %v2647_v41, 0.0  ;;  %v3122_v46 = vmax.f32 %v2656_v28, 0.0 }
 0x129   : > { %v1209_v56 = vmul.f32 %v1197_v40, %v3118_v9  ;;  %v1210_v17 = vmul.f32 %v1197_v40, %v3119_v29  ;;  %v1021_v39 = vmul.f32 %v1013_v12, %v3120_v7  ;;  %v3123_v32 = vmax.f32 %v2659_v49, 0.0  ;;  %v1109_v54 = vpop.permute.xlu1 %1108 }
 0x12a   : > { %v1022_v37 = vmul.f32 %v1013_v12, %v3121_v57  ;;  %v1207_v30 = vmul.f32 %v1193_v18, %v3122_v46  ;;  %v1027_v59 = vadd.f32 %v1019_v42, %v931_v16  ;;  %v1028_v4 = vadd.f32 %v1020_v38, %v932_v60 }
 0x12b   : > { %v1208_v31 = vmul.f32 %v1193_v18, %v3123_v32  ;;  %v1121_v61 = vadd.f32 %v1113_v24, %v1025_v63  ;;  %v1122_v20 = vadd.f32 %v1114_v14, %v1026_v8  ;;  %v933_v55 = vadd.f32 %v925_v21, %v837_v3 }
 0x12c   : > { %v934_v62 = vadd.f32 %v926_v26, %v838_v34  ;;  %v3125_v22 = vmax.f32 %v3124_v44, 0.0  ;;  %v3127_v41 = vmax.f32 %v3126_v36, 0.0  ;;  %v3129_v28 = vmax.f32 %v3128_v25, 0.0 }
 0x12d   : > { %v3131_v49 = vmax.f32 %v3130_v5, 0.0  ;;  %v1029_v53 = vadd.f32 %v1021_v39, %v933_v55  ;;  %v1215_v16 = vadd.f32 %v1207_v30, %v1119_v52  ;;  %v1216_v60 = vadd.f32 %v1208_v31, %v1120_v1 }
 0x12e   : > { %v1117_v11 = vmul.f32 %v1109_v54, %v3125_v22  ;;  %v1118_v12 = vmul.f32 %v1109_v54, %v3127_v41  ;;  %v1213_v48 = vmul.f32 %v1205_v10, %v3129_v28  ;;  %v1030_v18 = vadd.f32 %v1022_v37, %v934_v62  ;;  %v1201_v40 = vpop.permute.xlu1 %1200 }
 0x12f   : > { %v1214_v33 = vmul.f32 %v1205_v10, %v3131_v49  ;;  %v1123_v63 = vadd.f32 %v1115_v45, %v1027_v59  ;;  %v1124_v8 = vadd.f32 %v1116_v0, %v1028_v4  ;;  %v1217_v58 = vadd.f32 %v1209_v56, %v1121_v61 }
 0x130   : > { %v1218_v27 = vadd.f32 %v1210_v17, %v1122_v20  ;;  %v1125_v23 = vadd.f32 %v1117_v11, %v1029_v53  ;;  %v1126_v42 = vadd.f32 %v1118_v12, %v1030_v18  ;;  %v3133_v19 = vmax.f32 %v3132_v43, 0.0 }
 0x131   : > { %v1212_v35 = vmul.f32 %v1201_v40, %v1188_v50  ;;  %v1223_v24 = vadd.f32 %v1217_v58, %v1215_v16  ;;  %v1592_v26 = vmov 1966171168   ;;  %v1247_v1 = vlaneseq }
 0x132   : > { %v1211_v38 = vmul.f32 %v1201_v40, %v3133_v19  ;;  %v1232_v15 = vadd.f32 %v1218_v27, %v1216_v60  ;;  %v1221_v34 = vadd.f32 %v1213_v48, %v1125_v23  ;;  %v1222_v47 = vadd.f32 %v1214_v33, %v1126_v42 }
 0x133   : > { %v1220_v3 = vadd.f32 %v1212_v35, %v1124_v8  ;;  %v1245_v52 = vunpack.c.l.s4 %v1592_v26  ;;  %v1248_v17 = vshrl.u32 %v1247_v1, 7  ;;  %vm1261_vm0 = vcmp.lt.s32.totalorder %v1247_v1, 256 }
 0x134   : > { %v1219_v14 = vadd.f32 %v1211_v38, %v1123_v63 }
 0x135   : > { %v1233_v0 = vadd.f32 %v1232_v15, %v1220_v3  ;;  %v1246_v29 = vunpack.c.0.s8 %v1245_v52 }
 0x136   : > { %v1224_v45 = vadd.f32 %v1223_v24, %v1219_v14 }
 0x137   : > { %v1234_v21 = vadd.f32 %v1233_v0, %v1222_v47  ;;  %v1249_v46 = vsub.s32 %v1246_v29, %v1248_v17 }
 0x138   : > { %v1225_v13 = vadd.f32 %v1224_v45, %v1221_v34 }
 0x139   : > { %v1235_v6 = vrot.slane %v1234_v21, 4 }
 0x13a   : > { %v1226_v51 = vrot.slane %v1225_v13, 4 }
 0x13b   : > { %v1236_v56 = vadd.f32 %v1235_v6, %v1234_v21 }
 0x13c   : > { %v1227_v9 = vadd.f32 %v1226_v51, %v1225_v13 }
 0x13d   : > { %v1237_v50 = vrot.slane %v1236_v56, 2 }
 0x13e   : > { %v1228_v2 = vrot.slane %v1227_v9, 2 }
 0x13f   : > { %v1238_v39 = vadd.f32 %v1237_v50, %v1236_v56 }
 0x140   : > { %v1229_v7 = vadd.f32 %v1228_v2, %v1227_v9 }
 0x141   : > { %v1239_v37 = vrot.slane %v1238_v39, 1 }
 0x142   : > { %v1230_v57 = vrot.slane %v1229_v7, 1 }
 0x143   : > { %v1240_v32 = vadd.f32 %v1239_v37, %v1238_v39 }
 0x144   : > { %v1231_v30 = vadd.f32 %v1230_v57, %v1229_v7 }
 0x146   : > { %v1243_v31 = vcombine.low %v1231_v30, %v1240_v32 }
 0x148   : > { %v1250_v54 = vrot.slane %v1243_v31, %v1249_v46 }
 0x14a   : > { %v1257_v10 = vrot.slane %v1250_v54, %v1249_v46 }
 0x14c   : > { %1263 = vst.msk [vmem:[%s421_s23] sm:$0x3] %vm1261_vm0, %v1257_v10 }
 0x14d PF: > { %p15_p1 = scmp.ge.s32.totalorder %s1645_s25, 5   ;;  %s3134_s21 = smov %s1576_s22 }
 0x14e   : > { %s3135_s22 = smov %s1655_s28  ;;  %s3136_s23 = smov %s1645_s25 }
 0x14f   :  { %17 = sbr.rel (!%p15_p1) target bundleno = 3 (0x3), region = 173 }
 0x154   :  { %1284 = vsyncpa [#allocation3], 1 }
 0x155   :  { %1286 = vsyncpa [#allocation3 + $0x1], 1 }
 0x156   :  { %1287 = vsyncpa [#allocation5], 1 }

</bundles_post_ra>
